<compile_context>
chip_gen: v7x
topology: tpu7x:2x2x1
jax: 0.10.0
libtpu: 0.0.40
codegen_flags: <defaults>
</compile_context>

<pallas_src>
import functools
import math

import jax
import jax.numpy as jnp
from jax.experimental import pallas as pl
from jax.experimental.pallas import tpu as pltpu  # noqa: F401  (kept for TPU-specific tuning)

LN_EPS = 1e-5


# ----------------------------------------------------------------------------------
# In-kernel building blocks (operate on traced values, not refs).
# ----------------------------------------------------------------------------------
def _layer_norm(x, w, b):
    mu = jnp.mean(x, axis=-1, keepdims=True)
    var = jnp.mean((x - mu) ** 2, axis=-1, keepdims=True)
    return (x - mu) * jax.lax.rsqrt(var + LN_EPS) * w + b


def _encoder_block(x, wqkv, bqkv, wo, bo, ln1w, ln1b, w1, b1, w2, b2, ln2w, ln2b,
                   *, batch, seq, num_heads):
    BS, H = x.shape
    hd = H // num_heads
    scale = 1.0 / math.sqrt(hd)

    # ---- fused QKV projection (bf16 MXU, f32 accumulate) ----
    qkv = jnp.dot(x.astype(jnp.bfloat16), wqkv,
                  preferred_element_type=jnp.float32) + bqkv          # (B*S, 3H)

    # ---- multi-head attention: static head loop, lane slices + leading-dim reshapes ----
    ctx_heads = []
    for h in range(num_heads):
        qh = qkv[:, h * hd:(h + 1) * hd].reshape(batch, seq, hd).astype(jnp.bfloat16)
        kh = qkv[:, H + h * hd:H + (h + 1) * hd].reshape(batch, seq, hd).astype(jnp.bfloat16)
        vh = qkv[:, 2 * H + h * hd:2 * H + (h + 1) * hd].reshape(batch, seq, hd).astype(jnp.bfloat16)

        s = jnp.einsum('bqd,bkd->bqk', qh, kh,
                       preferred_element_type=jnp.float32) * scale    # (B, S, S) f32
        s = s - jnp.max(s, axis=-1, keepdims=True)
        p = jnp.exp(s)
        p = p * pl.reciprocal(jnp.sum(p, axis=-1, keepdims=True), approx=True)
        ctx = jnp.einsum('bqk,bkd->bqd', p.astype(jnp.bfloat16), vh,
                         preferred_element_type=jnp.float32)          # (B, S, hd) f32
        ctx_heads.append(ctx)

    attn = jnp.concatenate(ctx_heads, axis=-1).reshape(BS, H)         # (B*S, H)

    # ---- output projection + residual + LayerNorm 1 ----
    attn = jnp.dot(attn.astype(jnp.bfloat16), wo,
                   preferred_element_type=jnp.float32) + bo
    x1 = _layer_norm(x + attn, ln1w, ln1b)

    # ---- FFN: Linear -> ReLU -> [Dropout=id] -> Linear -> [Dropout=id] ----
    h1 = jnp.dot(x1.astype(jnp.bfloat16), w1,
                 preferred_element_type=jnp.float32) + b1
    h1 = jnp.maximum(h1, 0.0)
    ffn = jnp.dot(h1.astype(jnp.bfloat16), w2,
                  preferred_element_type=jnp.float32) + b2

    # ---- residual + LayerNorm 2 ----
    return _layer_norm(x1 + ffn, ln2w, ln2b)


# ----------------------------------------------------------------------------------
# Fused kernel: all layers unrolled inside one invocation; pooling + softmax epilogue.
# ----------------------------------------------------------------------------------
def fused_encoder_kernel(x_ref,                  # (B*S, H)   f32
                         wqkv_ref, bqkv_ref,     # (L, H, 3H) bf16, (L, 1, 3H) f32
                         wo_ref, bo_ref,         # (L, H, H)  bf16, (L, 1, H)  f32
                         ln1w_ref, ln1b_ref,     # (L, 1, H)  f32
                         w1_ref, b1_ref,         # (L, H, E)  bf16, (L, 1, E)  f32
                         w2_ref, b2_ref,         # (L, E, H)  bf16, (L, 1, H)  f32
                         ln2w_ref, ln2b_ref,     # (L, 1, H)  f32
                         o_ref,                  # (B, H)     f32
                         *, n_layers, batch, seq, num_heads):
    x = x_ref[...]                               # (B*S, H) f32, carried across layers in vregs
    for l in range(n_layers):                    # static unroll (tiny L)
        x = _encoder_block(
            x,
            wqkv_ref[l], bqkv_ref[l],
            wo_ref[l], bo_ref[l],
            ln1w_ref[l], ln1b_ref[l],
            w1_ref[l], b1_ref[l],
            w2_ref[l], b2_ref[l],
            ln2w_ref[l], ln2b_ref[l],
            batch=batch, seq=seq, num_heads=num_heads)

    # ---- epilogue: mean over sequence, EXACT softmax over hidden ----
    m = jnp.mean(x.reshape(batch, seq, -1), axis=1)          # (B, H)
    m = m - jnp.max(m, axis=-1, keepdims=True)
    e = jnp.exp(m)
    o_ref[...] = e / jnp.sum(e, axis=-1, keepdims=True)


# ----------------------------------------------------------------------------------
# Wrapper: stack per-layer params, pre-transpose / cast weights, single pallas_call.
# ----------------------------------------------------------------------------------
_PARAM_ORDER = ["wqkv_t", "bqkv", "wo_t", "bo", "ln1w", "ln1b",
                "w1_t", "b1", "w2_t", "b2", "ln2w", "ln2b"]


def stack_and_prepare(layer_params):
    def stk(name):
        return jnp.stack([p[name] for p in layer_params], axis=0)

    return {
        "wqkv_t": jnp.transpose(stk("wqkv"), (0, 2, 1)).astype(jnp.bfloat16),  # (L, H, 3H)
        "bqkv":   stk("bqkv")[:, None, :],                                     # (L, 1, 3H)
        "wo_t":   jnp.transpose(stk("wo"), (0, 2, 1)).astype(jnp.bfloat16),    # (L, H, H)
        "bo":     stk("bo")[:, None, :],                                       # (L, 1, H)
        "ln1w":   stk("ln1w")[:, None, :],
        "ln1b":   stk("ln1b")[:, None, :],
        "w1_t":   jnp.transpose(stk("w1"), (0, 2, 1)).astype(jnp.bfloat16),    # (L, H, E)
        "b1":     stk("b1")[:, None, :],                                       # (L, 1, E)
        "w2_t":   jnp.transpose(stk("w2"), (0, 2, 1)).astype(jnp.bfloat16),    # (L, E, H)
        "b2":     stk("b2")[:, None, :],                                       # (L, 1, H)
        "ln2w":   stk("ln2w")[:, None, :],
        "ln2b":   stk("ln2b")[:, None, :],
    }


def encoder_layer_forward(x, stacked, num_heads):
    B, S, H = x.shape
    L = stacked["wqkv_t"].shape[0]
    E = stacked["w1_t"].shape[2]
    hd = H // num_heads
    x2d = x.reshape(B * S, H)

    # Advisory cost estimate for XLA's scheduler.
    mm_flops = 2 * L * (B * S) * (3 * H * H + H * H + 2 * H * E)
    attn_flops = 2 * L * B * num_heads * (2 * S * S * hd)
    transcendentals = L * B * num_heads * S * S + B * H + 4 * L * B * S
    weight_bytes = sum(int(stacked[n].size) * stacked[n].dtype.itemsize for n in _PARAM_ORDER)
    bytes_accessed = int(x2d.size) * 4 + weight_bytes + B * H * 4

    kernel = functools.partial(fused_encoder_kernel,
                               n_layers=L, batch=B, seq=S, num_heads=num_heads)
    weight_args = [stacked[n] for n in _PARAM_ORDER]

    return pl.pallas_call(
        kernel,
        out_shape=jax.ShapeDtypeStruct((B, H), jnp.float32),
        cost_estimate=pl.CostEstimate(flops=mm_flops + attn_flops,
                                      transcendentals=transcendentals,
                                      bytes_accessed=bytes_accessed),
    )(x2d, *weight_args)


# ----------------------------------------------------------------------------------
# Deterministic synthetic parameter init (PyTorch-shaped weights).
# ----------------------------------------------------------------------------------
def init_encoder_params(key, H, E):
    ks = jax.random.split(key, 6)
    s = 0.1
    return {
        "wqkv": jax.random.normal(ks[0], (3 * H, H), jnp.float32) * s,
        "bqkv": jax.random.normal(ks[1], (3 * H,), jnp.float32) * s,
        "wo":   jax.random.normal(ks[2], (H, H), jnp.float32) * s,
        "bo":   jax.random.normal(ks[3], (H,), jnp.float32) * s,
        "ln1w": jnp.ones((H,), jnp.float32),
        "ln1b": jnp.zeros((H,), jnp.float32),
        "w1":   jax.random.normal(ks[4], (E, H), jnp.float32) * s,
        "b1":   jnp.zeros((E,), jnp.float32),
        "w2":   jax.random.normal(ks[5], (H, E), jnp.float32) * s,
        "b2":   jnp.zeros((H,), jnp.float32),
        "ln2w": jnp.ones((H,), jnp.float32),
        "ln2b": jnp.zeros((H,), jnp.float32),
    }


if __name__ == "__main__":
    B, S = 2, 8            # batch, sequence length
    H, E = 32, 64          # hidden_dim, embedding_dim
    NUM_HEADS = 4
    N_LAYERS = 2

    root = jax.random.PRNGKey(0)
    x = jax.random.normal(jax.random.fold_in(root, 123), (B, S, H), jnp.float32)

    layer_params = [init_encoder_params(jax.random.fold_in(root, i), H, E)
                    for i in range(N_LAYERS)]
    stacked = stack_and_prepare(layer_params)

    out = encoder_layer_forward(x, stacked, NUM_HEADS)
    out = jax.block_until_ready(out)
    assert out.shape == (B, H)
    assert bool(jnp.all(jnp.isfinite(out)))
    print("KERNEL_OK")
</pallas_src>

<mosaic_0001>
module attributes {stable_mosaic.version = 11 : i64} {
  func.func @fused_encoder_kernel(%arg0: memref<16x32xf32, #tpu.memory_space<vmem>>, %arg1: memref<2x32x96xbf16, #tpu.memory_space<vmem>>, %arg2: memref<2x1x96xf32, #tpu.memory_space<vmem>>, %arg3: memref<2x32x32xbf16, #tpu.memory_space<vmem>>, %arg4: memref<2x1x32xf32, #tpu.memory_space<vmem>>, %arg5: memref<2x1x32xf32, #tpu.memory_space<vmem>>, %arg6: memref<2x1x32xf32, #tpu.memory_space<vmem>>, %arg7: memref<2x32x64xbf16, #tpu.memory_space<vmem>>, %arg8: memref<2x1x64xf32, #tpu.memory_space<vmem>>, %arg9: memref<2x64x32xbf16, #tpu.memory_space<vmem>>, %arg10: memref<2x1x32xf32, #tpu.memory_space<vmem>>, %arg11: memref<2x1x32xf32, #tpu.memory_space<vmem>>, %arg12: memref<2x1x32xf32, #tpu.memory_space<vmem>>, %arg13: memref<2x32xf32, #tpu.memory_space<vmem>>) attributes {dimension_semantics = [], scalar_prefetch = 0 : i64, scratch_operands = 0 : i64, tpu.core_type = #tpu.core_type<tc>} {
    %c0 = arith.constant 0 : index
    %c0_0 = arith.constant 0 : index
    %0 = vector.load %arg0[%c0, %c0_0] : memref<16x32xf32, #tpu.memory_space<vmem>>, vector<16x32xf32>
    %c0_1 = arith.constant 0 : index
    %c0_2 = arith.constant 0 : index
    %c0_3 = arith.constant 0 : index
    %1 = vector.load %arg1[%c0_1, %c0_2, %c0_3] : memref<2x32x96xbf16, #tpu.memory_space<vmem>>, vector<1x32x96xbf16>
    %2 = vector.shape_cast %1 : vector<1x32x96xbf16> to vector<32x96xbf16>
    %c0_4 = arith.constant 0 : index
    %c0_5 = arith.constant 0 : index
    %c0_6 = arith.constant 0 : index
    %3 = vector.load %arg2[%c0_4, %c0_5, %c0_6] : memref<2x1x96xf32, #tpu.memory_space<vmem>>, vector<1x1x96xf32>
    %4 = vector.shape_cast %3 : vector<1x1x96xf32> to vector<1x96xf32>
    %c0_7 = arith.constant 0 : index
    %c0_8 = arith.constant 0 : index
    %c0_9 = arith.constant 0 : index
    %5 = vector.load %arg3[%c0_7, %c0_8, %c0_9] : memref<2x32x32xbf16, #tpu.memory_space<vmem>>, vector<1x32x32xbf16>
    %6 = vector.shape_cast %5 : vector<1x32x32xbf16> to vector<32x32xbf16>
    %c0_10 = arith.constant 0 : index
    %c0_11 = arith.constant 0 : index
    %c0_12 = arith.constant 0 : index
    %7 = vector.load %arg4[%c0_10, %c0_11, %c0_12] : memref<2x1x32xf32, #tpu.memory_space<vmem>>, vector<1x1x32xf32>
    %8 = vector.shape_cast %7 : vector<1x1x32xf32> to vector<1x32xf32>
    %c0_13 = arith.constant 0 : index
    %c0_14 = arith.constant 0 : index
    %c0_15 = arith.constant 0 : index
    %9 = vector.load %arg5[%c0_13, %c0_14, %c0_15] : memref<2x1x32xf32, #tpu.memory_space<vmem>>, vector<1x1x32xf32>
    %10 = vector.shape_cast %9 : vector<1x1x32xf32> to vector<1x32xf32>
    %c0_16 = arith.constant 0 : index
    %c0_17 = arith.constant 0 : index
    %c0_18 = arith.constant 0 : index
    %11 = vector.load %arg6[%c0_16, %c0_17, %c0_18] : memref<2x1x32xf32, #tpu.memory_space<vmem>>, vector<1x1x32xf32>
    %12 = vector.shape_cast %11 : vector<1x1x32xf32> to vector<1x32xf32>
    %c0_19 = arith.constant 0 : index
    %c0_20 = arith.constant 0 : index
    %c0_21 = arith.constant 0 : index
    %13 = vector.load %arg7[%c0_19, %c0_20, %c0_21] : memref<2x32x64xbf16, #tpu.memory_space<vmem>>, vector<1x32x64xbf16>
    %14 = vector.shape_cast %13 : vector<1x32x64xbf16> to vector<32x64xbf16>
    %c0_22 = arith.constant 0 : index
    %c0_23 = arith.constant 0 : index
    %c0_24 = arith.constant 0 : index
    %15 = vector.load %arg8[%c0_22, %c0_23, %c0_24] : memref<2x1x64xf32, #tpu.memory_space<vmem>>, vector<1x1x64xf32>
    %16 = vector.shape_cast %15 : vector<1x1x64xf32> to vector<1x64xf32>
    %c0_25 = arith.constant 0 : index
    %c0_26 = arith.constant 0 : index
    %c0_27 = arith.constant 0 : index
    %17 = vector.load %arg9[%c0_25, %c0_26, %c0_27] : memref<2x64x32xbf16, #tpu.memory_space<vmem>>, vector<1x64x32xbf16>
    %18 = vector.shape_cast %17 : vector<1x64x32xbf16> to vector<64x32xbf16>
    %c0_28 = arith.constant 0 : index
    %c0_29 = arith.constant 0 : index
    %c0_30 = arith.constant 0 : index
    %19 = vector.load %arg10[%c0_28, %c0_29, %c0_30] : memref<2x1x32xf32, #tpu.memory_space<vmem>>, vector<1x1x32xf32>
    %20 = vector.shape_cast %19 : vector<1x1x32xf32> to vector<1x32xf32>
    %c0_31 = arith.constant 0 : index
    %c0_32 = arith.constant 0 : index
    %c0_33 = arith.constant 0 : index
    %21 = vector.load %arg11[%c0_31, %c0_32, %c0_33] : memref<2x1x32xf32, #tpu.memory_space<vmem>>, vector<1x1x32xf32>
    %22 = vector.shape_cast %21 : vector<1x1x32xf32> to vector<1x32xf32>
    %c0_34 = arith.constant 0 : index
    %c0_35 = arith.constant 0 : index
    %c0_36 = arith.constant 0 : index
    %23 = vector.load %arg12[%c0_34, %c0_35, %c0_36] : memref<2x1x32xf32, #tpu.memory_space<vmem>>, vector<1x1x32xf32>
    %24 = vector.shape_cast %23 : vector<1x1x32xf32> to vector<1x32xf32>
    %25 = arith.truncf %0 : vector<16x32xf32> to vector<16x32xbf16>
    %cst = arith.constant dense<0.000000e+00> : vector<16x96xf32>
    %26 = tpu.matmul %25, %2, %cst {dimension_numbers = #tpu.dot_dimension_numbers<[1], [0], [0], [1], [0, 0, 1, 1], [], []>} : vector<16x32xbf16>, vector<32x96xbf16>, vector<16x96xf32> -> vector<16x96xf32>
    %27 = vector.broadcast %4 : vector<1x96xf32> to vector<16x96xf32>
    %28 = arith.addf %26, %27 : vector<16x96xf32>
    %29 = vector.extract_strided_slice %28 {offsets = [0, 0], sizes = [16, 8], strides = [1, 1]} : vector<16x96xf32> to vector<16x8xf32>
    %30 = vector.shape_cast %29 : vector<16x8xf32> to vector<2x8x8xf32>
    %31 = arith.truncf %30 : vector<2x8x8xf32> to vector<2x8x8xbf16>
    %32 = vector.extract_strided_slice %28 {offsets = [0, 32], sizes = [16, 8], strides = [1, 1]} : vector<16x96xf32> to vector<16x8xf32>
    %33 = vector.shape_cast %32 : vector<16x8xf32> to vector<2x8x8xf32>
    %34 = arith.truncf %33 : vector<2x8x8xf32> to vector<2x8x8xbf16>
    %35 = vector.extract_strided_slice %28 {offsets = [0, 64], sizes = [16, 8], strides = [1, 1]} : vector<16x96xf32> to vector<16x8xf32>
    %36 = vector.shape_cast %35 : vector<16x8xf32> to vector<2x8x8xf32>
    %37 = arith.truncf %36 : vector<2x8x8xf32> to vector<2x8x8xbf16>
    "tpu.trace_start"() <{level = 10 : i32, message = "bqd,bkd->bqk"}> : () -> ()
    %cst_37 = arith.constant dense<0.000000e+00> : vector<2x8x8xf32>
    %38 = tpu.matmul %31, %34, %cst_37 {dimension_numbers = #tpu.dot_dimension_numbers<[2], [2], [1], [1], [0, 0, 0, 1, 1, 1], [0], [0]>} : vector<2x8x8xbf16>, vector<2x8x8xbf16>, vector<2x8x8xf32> -> vector<2x8x8xf32>
    "tpu.trace_stop"() : () -> ()
    %cst_38 = arith.constant 0.353553385 : f32
    %39 = vector.broadcast %cst_38 : f32 to vector<2x8x8xf32>
    %40 = arith.mulf %38, %39 : vector<2x8x8xf32>
    %cst_39 = arith.constant dense<0xFF800000> : vector<2x8xf32>
    %41 = vector.multi_reduction <maximumf>, %40, %cst_39 [2] : vector<2x8x8xf32> to vector<2x8xf32>
    %42 = vector.shape_cast %41 : vector<2x8xf32> to vector<2x8x1xf32>
    %43 = vector.broadcast %42 : vector<2x8x1xf32> to vector<2x8x8xf32>
    %44 = arith.subf %40, %43 : vector<2x8x8xf32>
    %45 = math.exp %44 : vector<2x8x8xf32>
    %cst_40 = arith.constant dense<0.000000e+00> : vector<2x8xf32>
    %46 = vector.multi_reduction <add>, %45, %cst_40 [2] : vector<2x8x8xf32> to vector<2x8xf32>
    %47 = vector.shape_cast %46 : vector<2x8xf32> to vector<2x8x1xf32>
    %48 = tpu.reciprocal %47 {approx = true} : vector<2x8x1xf32> -> vector<2x8x1xf32>
    %49 = vector.broadcast %48 : vector<2x8x1xf32> to vector<2x8x8xf32>
    %50 = arith.mulf %45, %49 : vector<2x8x8xf32>
    %51 = arith.truncf %50 : vector<2x8x8xf32> to vector<2x8x8xbf16>
    "tpu.trace_start"() <{level = 10 : i32, message = "bqk,bkd->bqd"}> : () -> ()
    %cst_41 = arith.constant dense<0.000000e+00> : vector<2x8x8xf32>
    %52 = tpu.matmul %51, %37, %cst_41 {dimension_numbers = #tpu.dot_dimension_numbers<[2], [1], [1], [2], [0, 0, 0, 1, 1, 2], [0], [0]>} : vector<2x8x8xbf16>, vector<2x8x8xbf16>, vector<2x8x8xf32> -> vector<2x8x8xf32>
    "tpu.trace_stop"() : () -> ()
    %53 = vector.extract_strided_slice %28 {offsets = [0, 8], sizes = [16, 8], strides = [1, 1]} : vector<16x96xf32> to vector<16x8xf32>
    %54 = vector.shape_cast %53 : vector<16x8xf32> to vector<2x8x8xf32>
    %55 = arith.truncf %54 : vector<2x8x8xf32> to vector<2x8x8xbf16>
    %56 = vector.extract_strided_slice %28 {offsets = [0, 40], sizes = [16, 8], strides = [1, 1]} : vector<16x96xf32> to vector<16x8xf32>
    %57 = vector.shape_cast %56 : vector<16x8xf32> to vector<2x8x8xf32>
    %58 = arith.truncf %57 : vector<2x8x8xf32> to vector<2x8x8xbf16>
    %59 = vector.extract_strided_slice %28 {offsets = [0, 72], sizes = [16, 8], strides = [1, 1]} : vector<16x96xf32> to vector<16x8xf32>
    %60 = vector.shape_cast %59 : vector<16x8xf32> to vector<2x8x8xf32>
    %61 = arith.truncf %60 : vector<2x8x8xf32> to vector<2x8x8xbf16>
    "tpu.trace_start"() <{level = 10 : i32, message = "bqd,bkd->bqk"}> : () -> ()
    %cst_42 = arith.constant dense<0.000000e+00> : vector<2x8x8xf32>
    %62 = tpu.matmul %55, %58, %cst_42 {dimension_numbers = #tpu.dot_dimension_numbers<[2], [2], [1], [1], [0, 0, 0, 1, 1, 1], [0], [0]>} : vector<2x8x8xbf16>, vector<2x8x8xbf16>, vector<2x8x8xf32> -> vector<2x8x8xf32>
    "tpu.trace_stop"() : () -> ()
    %cst_43 = arith.constant 0.353553385 : f32
    %63 = vector.broadcast %cst_43 : f32 to vector<2x8x8xf32>
    %64 = arith.mulf %62, %63 : vector<2x8x8xf32>
    %cst_44 = arith.constant dense<0xFF800000> : vector<2x8xf32>
    %65 = vector.multi_reduction <maximumf>, %64, %cst_44 [2] : vector<2x8x8xf32> to vector<2x8xf32>
    %66 = vector.shape_cast %65 : vector<2x8xf32> to vector<2x8x1xf32>
    %67 = vector.broadcast %66 : vector<2x8x1xf32> to vector<2x8x8xf32>
    %68 = arith.subf %64, %67 : vector<2x8x8xf32>
    %69 = math.exp %68 : vector<2x8x8xf32>
    %cst_45 = arith.constant dense<0.000000e+00> : vector<2x8xf32>
    %70 = vector.multi_reduction <add>, %69, %cst_45 [2] : vector<2x8x8xf32> to vector<2x8xf32>
    %71 = vector.shape_cast %70 : vector<2x8xf32> to vector<2x8x1xf32>
    %72 = tpu.reciprocal %71 {approx = true} : vector<2x8x1xf32> -> vector<2x8x1xf32>
    %73 = vector.broadcast %72 : vector<2x8x1xf32> to vector<2x8x8xf32>
    %74 = arith.mulf %69, %73 : vector<2x8x8xf32>
    %75 = arith.truncf %74 : vector<2x8x8xf32> to vector<2x8x8xbf16>
    "tpu.trace_start"() <{level = 10 : i32, message = "bqk,bkd->bqd"}> : () -> ()
    %cst_46 = arith.constant dense<0.000000e+00> : vector<2x8x8xf32>
    %76 = tpu.matmul %75, %61, %cst_46 {dimension_numbers = #tpu.dot_dimension_numbers<[2], [1], [1], [2], [0, 0, 0, 1, 1, 2], [0], [0]>} : vector<2x8x8xbf16>, vector<2x8x8xbf16>, vector<2x8x8xf32> -> vector<2x8x8xf32>
    "tpu.trace_stop"() : () -> ()
    %77 = vector.extract_strided_slice %28 {offsets = [0, 16], sizes = [16, 8], strides = [1, 1]} : vector<16x96xf32> to vector<16x8xf32>
    %78 = vector.shape_cast %77 : vector<16x8xf32> to vector<2x8x8xf32>
    %79 = arith.truncf %78 : vector<2x8x8xf32> to vector<2x8x8xbf16>
    %80 = vector.extract_strided_slice %28 {offsets = [0, 48], sizes = [16, 8], strides = [1, 1]} : vector<16x96xf32> to vector<16x8xf32>
    %81 = vector.shape_cast %80 : vector<16x8xf32> to vector<2x8x8xf32>
    %82 = arith.truncf %81 : vector<2x8x8xf32> to vector<2x8x8xbf16>
    %83 = vector.extract_strided_slice %28 {offsets = [0, 80], sizes = [16, 8], strides = [1, 1]} : vector<16x96xf32> to vector<16x8xf32>
    %84 = vector.shape_cast %83 : vector<16x8xf32> to vector<2x8x8xf32>
    %85 = arith.truncf %84 : vector<2x8x8xf32> to vector<2x8x8xbf16>
    "tpu.trace_start"() <{level = 10 : i32, message = "bqd,bkd->bqk"}> : () -> ()
    %cst_47 = arith.constant dense<0.000000e+00> : vector<2x8x8xf32>
    %86 = tpu.matmul %79, %82, %cst_47 {dimension_numbers = #tpu.dot_dimension_numbers<[2], [2], [1], [1], [0, 0, 0, 1, 1, 1], [0], [0]>} : vector<2x8x8xbf16>, vector<2x8x8xbf16>, vector<2x8x8xf32> -> vector<2x8x8xf32>
    "tpu.trace_stop"() : () -> ()
    %cst_48 = arith.constant 0.353553385 : f32
    %87 = vector.broadcast %cst_48 : f32 to vector<2x8x8xf32>
    %88 = arith.mulf %86, %87 : vector<2x8x8xf32>
    %cst_49 = arith.constant dense<0xFF800000> : vector<2x8xf32>
    %89 = vector.multi_reduction <maximumf>, %88, %cst_49 [2] : vector<2x8x8xf32> to vector<2x8xf32>
    %90 = vector.shape_cast %89 : vector<2x8xf32> to vector<2x8x1xf32>
    %91 = vector.broadcast %90 : vector<2x8x1xf32> to vector<2x8x8xf32>
    %92 = arith.subf %88, %91 : vector<2x8x8xf32>
    %93 = math.exp %92 : vector<2x8x8xf32>
    %cst_50 = arith.constant dense<0.000000e+00> : vector<2x8xf32>
    %94 = vector.multi_reduction <add>, %93, %cst_50 [2] : vector<2x8x8xf32> to vector<2x8xf32>
    %95 = vector.shape_cast %94 : vector<2x8xf32> to vector<2x8x1xf32>
    %96 = tpu.reciprocal %95 {approx = true} : vector<2x8x1xf32> -> vector<2x8x1xf32>
    %97 = vector.broadcast %96 : vector<2x8x1xf32> to vector<2x8x8xf32>
    %98 = arith.mulf %93, %97 : vector<2x8x8xf32>
    %99 = arith.truncf %98 : vector<2x8x8xf32> to vector<2x8x8xbf16>
    "tpu.trace_start"() <{level = 10 : i32, message = "bqk,bkd->bqd"}> : () -> ()
    %cst_51 = arith.constant dense<0.000000e+00> : vector<2x8x8xf32>
    %100 = tpu.matmul %99, %85, %cst_51 {dimension_numbers = #tpu.dot_dimension_numbers<[2], [1], [1], [2], [0, 0, 0, 1, 1, 2], [0], [0]>} : vector<2x8x8xbf16>, vector<2x8x8xbf16>, vector<2x8x8xf32> -> vector<2x8x8xf32>
    "tpu.trace_stop"() : () -> ()
    %101 = vector.extract_strided_slice %28 {offsets = [0, 24], sizes = [16, 8], strides = [1, 1]} : vector<16x96xf32> to vector<16x8xf32>
    %102 = vector.shape_cast %101 : vector<16x8xf32> to vector<2x8x8xf32>
    %103 = arith.truncf %102 : vector<2x8x8xf32> to vector<2x8x8xbf16>
    %104 = vector.extract_strided_slice %28 {offsets = [0, 56], sizes = [16, 8], strides = [1, 1]} : vector<16x96xf32> to vector<16x8xf32>
    %105 = vector.shape_cast %104 : vector<16x8xf32> to vector<2x8x8xf32>
    %106 = arith.truncf %105 : vector<2x8x8xf32> to vector<2x8x8xbf16>
    %107 = vector.extract_strided_slice %28 {offsets = [0, 88], sizes = [16, 8], strides = [1, 1]} : vector<16x96xf32> to vector<16x8xf32>
    %108 = vector.shape_cast %107 : vector<16x8xf32> to vector<2x8x8xf32>
    %109 = arith.truncf %108 : vector<2x8x8xf32> to vector<2x8x8xbf16>
    "tpu.trace_start"() <{level = 10 : i32, message = "bqd,bkd->bqk"}> : () -> ()
    %cst_52 = arith.constant dense<0.000000e+00> : vector<2x8x8xf32>
    %110 = tpu.matmul %103, %106, %cst_52 {dimension_numbers = #tpu.dot_dimension_numbers<[2], [2], [1], [1], [0, 0, 0, 1, 1, 1], [0], [0]>} : vector<2x8x8xbf16>, vector<2x8x8xbf16>, vector<2x8x8xf32> -> vector<2x8x8xf32>
    "tpu.trace_stop"() : () -> ()
    %cst_53 = arith.constant 0.353553385 : f32
    %111 = vector.broadcast %cst_53 : f32 to vector<2x8x8xf32>
    %112 = arith.mulf %110, %111 : vector<2x8x8xf32>
    %cst_54 = arith.constant dense<0xFF800000> : vector<2x8xf32>
    %113 = vector.multi_reduction <maximumf>, %112, %cst_54 [2] : vector<2x8x8xf32> to vector<2x8xf32>
    %114 = vector.shape_cast %113 : vector<2x8xf32> to vector<2x8x1xf32>
    %115 = vector.broadcast %114 : vector<2x8x1xf32> to vector<2x8x8xf32>
    %116 = arith.subf %112, %115 : vector<2x8x8xf32>
    %117 = math.exp %116 : vector<2x8x8xf32>
    %cst_55 = arith.constant dense<0.000000e+00> : vector<2x8xf32>
    %118 = vector.multi_reduction <add>, %117, %cst_55 [2] : vector<2x8x8xf32> to vector<2x8xf32>
    %119 = vector.shape_cast %118 : vector<2x8xf32> to vector<2x8x1xf32>
    %120 = tpu.reciprocal %119 {approx = true} : vector<2x8x1xf32> -> vector<2x8x1xf32>
    %121 = vector.broadcast %120 : vector<2x8x1xf32> to vector<2x8x8xf32>
    %122 = arith.mulf %117, %121 : vector<2x8x8xf32>
    %123 = arith.truncf %122 : vector<2x8x8xf32> to vector<2x8x8xbf16>
    "tpu.trace_start"() <{level = 10 : i32, message = "bqk,bkd->bqd"}> : () -> ()
    %cst_56 = arith.constant dense<0.000000e+00> : vector<2x8x8xf32>
    %124 = tpu.matmul %123, %109, %cst_56 {dimension_numbers = #tpu.dot_dimension_numbers<[2], [1], [1], [2], [0, 0, 0, 1, 1, 2], [0], [0]>} : vector<2x8x8xbf16>, vector<2x8x8xbf16>, vector<2x8x8xf32> -> vector<2x8x8xf32>
    "tpu.trace_stop"() : () -> ()
    %125 = tpu.concatenate %52, %76, %100, %124 in 2 : vector<2x8x8xf32>, vector<2x8x8xf32>, vector<2x8x8xf32>, vector<2x8x8xf32> -> vector<2x8x32xf32>
    %126 = vector.shape_cast %125 : vector<2x8x32xf32> to vector<16x32xf32>
    %127 = arith.truncf %126 : vector<16x32xf32> to vector<16x32xbf16>
    %cst_57 = arith.constant dense<0.000000e+00> : vector<16x32xf32>
    %128 = tpu.matmul %127, %6, %cst_57 {dimension_numbers = #tpu.dot_dimension_numbers<[1], [0], [0], [1], [0, 0, 1, 1], [], []>} : vector<16x32xbf16>, vector<32x32xbf16>, vector<16x32xf32> -> vector<16x32xf32>
    %129 = vector.broadcast %8 : vector<1x32xf32> to vector<16x32xf32>
    %130 = arith.addf %128, %129 : vector<16x32xf32>
    %131 = arith.addf %0, %130 : vector<16x32xf32>
    %cst_58 = arith.constant dense<0.000000e+00> : vector<16xf32>
    %132 = vector.multi_reduction <add>, %131, %cst_58 [1] : vector<16x32xf32> to vector<16xf32>
    %133 = vector.shape_cast %132 : vector<16xf32> to vector<16x1xf32>
    %cst_59 = arith.constant 3.200000e+01 : f32
    %134 = vector.broadcast %cst_59 : f32 to vector<16x1xf32>
    %135 = arith.divf %133, %134 : vector<16x1xf32>
    %136 = vector.broadcast %135 : vector<16x1xf32> to vector<16x32xf32>
    %137 = arith.subf %131, %136 : vector<16x32xf32>
    %138 = arith.mulf %137, %137 : vector<16x32xf32>
    %cst_60 = arith.constant dense<0.000000e+00> : vector<16xf32>
    %139 = vector.multi_reduction <add>, %138, %cst_60 [1] : vector<16x32xf32> to vector<16xf32>
    %140 = vector.shape_cast %139 : vector<16xf32> to vector<16x1xf32>
    %cst_61 = arith.constant 3.200000e+01 : f32
    %141 = vector.broadcast %cst_61 : f32 to vector<16x1xf32>
    %142 = arith.divf %140, %141 : vector<16x1xf32>
    %143 = vector.broadcast %135 : vector<16x1xf32> to vector<16x32xf32>
    %144 = arith.subf %131, %143 : vector<16x32xf32>
    %cst_62 = arith.constant 9.99999974E-6 : f32
    %145 = vector.broadcast %cst_62 : f32 to vector<16x1xf32>
    %146 = arith.addf %142, %145 : vector<16x1xf32>
    %147 = math.rsqrt %146 : vector<16x1xf32>
    %148 = vector.broadcast %147 : vector<16x1xf32> to vector<16x32xf32>
    %149 = arith.mulf %144, %148 : vector<16x32xf32>
    %150 = vector.broadcast %10 : vector<1x32xf32> to vector<16x32xf32>
    %151 = arith.mulf %149, %150 : vector<16x32xf32>
    %152 = vector.broadcast %12 : vector<1x32xf32> to vector<16x32xf32>
    %153 = arith.addf %151, %152 : vector<16x32xf32>
    %154 = arith.truncf %153 : vector<16x32xf32> to vector<16x32xbf16>
    %cst_63 = arith.constant dense<0.000000e+00> : vector<16x64xf32>
    %155 = tpu.matmul %154, %14, %cst_63 {dimension_numbers = #tpu.dot_dimension_numbers<[1], [0], [0], [1], [0, 0, 1, 1], [], []>} : vector<16x32xbf16>, vector<32x64xbf16>, vector<16x64xf32> -> vector<16x64xf32>
    %156 = vector.broadcast %16 : vector<1x64xf32> to vector<16x64xf32>
    %157 = arith.addf %155, %156 : vector<16x64xf32>
    %cst_64 = arith.constant 0.000000e+00 : f32
    %158 = vector.broadcast %cst_64 : f32 to vector<16x64xf32>
    %159 = arith.maximumf %157, %158 : vector<16x64xf32>
    %160 = arith.truncf %159 : vector<16x64xf32> to vector<16x64xbf16>
    %cst_65 = arith.constant dense<0.000000e+00> : vector<16x32xf32>
    %161 = tpu.matmul %160, %18, %cst_65 {dimension_numbers = #tpu.dot_dimension_numbers<[1], [0], [0], [1], [0, 0, 1, 1], [], []>} : vector<16x64xbf16>, vector<64x32xbf16>, vector<16x32xf32> -> vector<16x32xf32>
    %162 = vector.broadcast %20 : vector<1x32xf32> to vector<16x32xf32>
    %163 = arith.addf %161, %162 : vector<16x32xf32>
    %164 = arith.addf %153, %163 : vector<16x32xf32>
    %cst_66 = arith.constant dense<0.000000e+00> : vector<16xf32>
    %165 = vector.multi_reduction <add>, %164, %cst_66 [1] : vector<16x32xf32> to vector<16xf32>
    %166 = vector.shape_cast %165 : vector<16xf32> to vector<16x1xf32>
    %cst_67 = arith.constant 3.200000e+01 : f32
    %167 = vector.broadcast %cst_67 : f32 to vector<16x1xf32>
    %168 = arith.divf %166, %167 : vector<16x1xf32>
    %169 = vector.broadcast %168 : vector<16x1xf32> to vector<16x32xf32>
    %170 = arith.subf %164, %169 : vector<16x32xf32>
    %171 = arith.mulf %170, %170 : vector<16x32xf32>
    %cst_68 = arith.constant dense<0.000000e+00> : vector<16xf32>
    %172 = vector.multi_reduction <add>, %171, %cst_68 [1] : vector<16x32xf32> to vector<16xf32>
    %173 = vector.shape_cast %172 : vector<16xf32> to vector<16x1xf32>
    %cst_69 = arith.constant 3.200000e+01 : f32
    %174 = vector.broadcast %cst_69 : f32 to vector<16x1xf32>
    %175 = arith.divf %173, %174 : vector<16x1xf32>
    %176 = vector.broadcast %168 : vector<16x1xf32> to vector<16x32xf32>
    %177 = arith.subf %164, %176 : vector<16x32xf32>
    %cst_70 = arith.constant 9.99999974E-6 : f32
    %178 = vector.broadcast %cst_70 : f32 to vector<16x1xf32>
    %179 = arith.addf %175, %178 : vector<16x1xf32>
    %180 = math.rsqrt %179 : vector<16x1xf32>
    %181 = vector.broadcast %180 : vector<16x1xf32> to vector<16x32xf32>
    %182 = arith.mulf %177, %181 : vector<16x32xf32>
    %183 = vector.broadcast %22 : vector<1x32xf32> to vector<16x32xf32>
    %184 = arith.mulf %182, %183 : vector<16x32xf32>
    %185 = vector.broadcast %24 : vector<1x32xf32> to vector<16x32xf32>
    %186 = arith.addf %184, %185 : vector<16x32xf32>
    %c1 = arith.constant 1 : index
    %c0_71 = arith.constant 0 : index
    %c0_72 = arith.constant 0 : index
    %187 = vector.load %arg1[%c1, %c0_71, %c0_72] : memref<2x32x96xbf16, #tpu.memory_space<vmem>>, vector<1x32x96xbf16>
    %188 = vector.shape_cast %187 : vector<1x32x96xbf16> to vector<32x96xbf16>
    %c1_73 = arith.constant 1 : index
    %c0_74 = arith.constant 0 : index
    %c0_75 = arith.constant 0 : index
    %189 = vector.load %arg2[%c1_73, %c0_74, %c0_75] : memref<2x1x96xf32, #tpu.memory_space<vmem>>, vector<1x1x96xf32>
    %190 = vector.shape_cast %189 : vector<1x1x96xf32> to vector<1x96xf32>
    %c1_76 = arith.constant 1 : index
    %c0_77 = arith.constant 0 : index
    %c0_78 = arith.constant 0 : index
    %191 = vector.load %arg3[%c1_76, %c0_77, %c0_78] : memref<2x32x32xbf16, #tpu.memory_space<vmem>>, vector<1x32x32xbf16>
    %192 = vector.shape_cast %191 : vector<1x32x32xbf16> to vector<32x32xbf16>
    %c1_79 = arith.constant 1 : index
    %c0_80 = arith.constant 0 : index
    %c0_81 = arith.constant 0 : index
    %193 = vector.load %arg4[%c1_79, %c0_80, %c0_81] : memref<2x1x32xf32, #tpu.memory_space<vmem>>, vector<1x1x32xf32>
    %194 = vector.shape_cast %193 : vector<1x1x32xf32> to vector<1x32xf32>
    %c1_82 = arith.constant 1 : index
    %c0_83 = arith.constant 0 : index
    %c0_84 = arith.constant 0 : index
    %195 = vector.load %arg5[%c1_82, %c0_83, %c0_84] : memref<2x1x32xf32, #tpu.memory_space<vmem>>, vector<1x1x32xf32>
    %196 = vector.shape_cast %195 : vector<1x1x32xf32> to vector<1x32xf32>
    %c1_85 = arith.constant 1 : index
    %c0_86 = arith.constant 0 : index
    %c0_87 = arith.constant 0 : index
    %197 = vector.load %arg6[%c1_85, %c0_86, %c0_87] : memref<2x1x32xf32, #tpu.memory_space<vmem>>, vector<1x1x32xf32>
    %198 = vector.shape_cast %197 : vector<1x1x32xf32> to vector<1x32xf32>
    %c1_88 = arith.constant 1 : index
    %c0_89 = arith.constant 0 : index
    %c0_90 = arith.constant 0 : index
    %199 = vector.load %arg7[%c1_88, %c0_89, %c0_90] : memref<2x32x64xbf16, #tpu.memory_space<vmem>>, vector<1x32x64xbf16>
    %200 = vector.shape_cast %199 : vector<1x32x64xbf16> to vector<32x64xbf16>
    %c1_91 = arith.constant 1 : index
    %c0_92 = arith.constant 0 : index
    %c0_93 = arith.constant 0 : index
    %201 = vector.load %arg8[%c1_91, %c0_92, %c0_93] : memref<2x1x64xf32, #tpu.memory_space<vmem>>, vector<1x1x64xf32>
    %202 = vector.shape_cast %201 : vector<1x1x64xf32> to vector<1x64xf32>
    %c1_94 = arith.constant 1 : index
    %c0_95 = arith.constant 0 : index
    %c0_96 = arith.constant 0 : index
    %203 = vector.load %arg9[%c1_94, %c0_95, %c0_96] : memref<2x64x32xbf16, #tpu.memory_space<vmem>>, vector<1x64x32xbf16>
    %204 = vector.shape_cast %203 : vector<1x64x32xbf16> to vector<64x32xbf16>
    %c1_97 = arith.constant 1 : index
    %c0_98 = arith.constant 0 : index
    %c0_99 = arith.constant 0 : index
    %205 = vector.load %arg10[%c1_97, %c0_98, %c0_99] : memref<2x1x32xf32, #tpu.memory_space<vmem>>, vector<1x1x32xf32>
    %206 = vector.shape_cast %205 : vector<1x1x32xf32> to vector<1x32xf32>
    %c1_100 = arith.constant 1 : index
    %c0_101 = arith.constant 0 : index
    %c0_102 = arith.constant 0 : index
    %207 = vector.load %arg11[%c1_100, %c0_101, %c0_102] : memref<2x1x32xf32, #tpu.memory_space<vmem>>, vector<1x1x32xf32>
    %208 = vector.shape_cast %207 : vector<1x1x32xf32> to vector<1x32xf32>
    %c1_103 = arith.constant 1 : index
    %c0_104 = arith.constant 0 : index
    %c0_105 = arith.constant 0 : index
    %209 = vector.load %arg12[%c1_103, %c0_104, %c0_105] : memref<2x1x32xf32, #tpu.memory_space<vmem>>, vector<1x1x32xf32>
    %210 = vector.shape_cast %209 : vector<1x1x32xf32> to vector<1x32xf32>
    %211 = arith.truncf %186 : vector<16x32xf32> to vector<16x32xbf16>
    %cst_106 = arith.constant dense<0.000000e+00> : vector<16x96xf32>
    %212 = tpu.matmul %211, %188, %cst_106 {dimension_numbers = #tpu.dot_dimension_numbers<[1], [0], [0], [1], [0, 0, 1, 1], [], []>} : vector<16x32xbf16>, vector<32x96xbf16>, vector<16x96xf32> -> vector<16x96xf32>
    %213 = vector.broadcast %190 : vector<1x96xf32> to vector<16x96xf32>
    %214 = arith.addf %212, %213 : vector<16x96xf32>
    %215 = vector.extract_strided_slice %214 {offsets = [0, 0], sizes = [16, 8], strides = [1, 1]} : vector<16x96xf32> to vector<16x8xf32>
    %216 = vector.shape_cast %215 : vector<16x8xf32> to vector<2x8x8xf32>
    %217 = arith.truncf %216 : vector<2x8x8xf32> to vector<2x8x8xbf16>
    %218 = vector.extract_strided_slice %214 {offsets = [0, 32], sizes = [16, 8], strides = [1, 1]} : vector<16x96xf32> to vector<16x8xf32>
    %219 = vector.shape_cast %218 : vector<16x8xf32> to vector<2x8x8xf32>
    %220 = arith.truncf %219 : vector<2x8x8xf32> to vector<2x8x8xbf16>
    %221 = vector.extract_strided_slice %214 {offsets = [0, 64], sizes = [16, 8], strides = [1, 1]} : vector<16x96xf32> to vector<16x8xf32>
    %222 = vector.shape_cast %221 : vector<16x8xf32> to vector<2x8x8xf32>
    %223 = arith.truncf %222 : vector<2x8x8xf32> to vector<2x8x8xbf16>
    "tpu.trace_start"() <{level = 10 : i32, message = "bqd,bkd->bqk"}> : () -> ()
    %cst_107 = arith.constant dense<0.000000e+00> : vector<2x8x8xf32>
    %224 = tpu.matmul %217, %220, %cst_107 {dimension_numbers = #tpu.dot_dimension_numbers<[2], [2], [1], [1], [0, 0, 0, 1, 1, 1], [0], [0]>} : vector<2x8x8xbf16>, vector<2x8x8xbf16>, vector<2x8x8xf32> -> vector<2x8x8xf32>
    "tpu.trace_stop"() : () -> ()
    %cst_108 = arith.constant 0.353553385 : f32
    %225 = vector.broadcast %cst_108 : f32 to vector<2x8x8xf32>
    %226 = arith.mulf %224, %225 : vector<2x8x8xf32>
    %cst_109 = arith.constant dense<0xFF800000> : vector<2x8xf32>
    %227 = vector.multi_reduction <maximumf>, %226, %cst_109 [2] : vector<2x8x8xf32> to vector<2x8xf32>
    %228 = vector.shape_cast %227 : vector<2x8xf32> to vector<2x8x1xf32>
    %229 = vector.broadcast %228 : vector<2x8x1xf32> to vector<2x8x8xf32>
    %230 = arith.subf %226, %229 : vector<2x8x8xf32>
    %231 = math.exp %230 : vector<2x8x8xf32>
    %cst_110 = arith.constant dense<0.000000e+00> : vector<2x8xf32>
    %232 = vector.multi_reduction <add>, %231, %cst_110 [2] : vector<2x8x8xf32> to vector<2x8xf32>
    %233 = vector.shape_cast %232 : vector<2x8xf32> to vector<2x8x1xf32>
    %234 = tpu.reciprocal %233 {approx = true} : vector<2x8x1xf32> -> vector<2x8x1xf32>
    %235 = vector.broadcast %234 : vector<2x8x1xf32> to vector<2x8x8xf32>
    %236 = arith.mulf %231, %235 : vector<2x8x8xf32>
    %237 = arith.truncf %236 : vector<2x8x8xf32> to vector<2x8x8xbf16>
    "tpu.trace_start"() <{level = 10 : i32, message = "bqk,bkd->bqd"}> : () -> ()
    %cst_111 = arith.constant dense<0.000000e+00> : vector<2x8x8xf32>
    %238 = tpu.matmul %237, %223, %cst_111 {dimension_numbers = #tpu.dot_dimension_numbers<[2], [1], [1], [2], [0, 0, 0, 1, 1, 2], [0], [0]>} : vector<2x8x8xbf16>, vector<2x8x8xbf16>, vector<2x8x8xf32> -> vector<2x8x8xf32>
    "tpu.trace_stop"() : () -> ()
    %239 = vector.extract_strided_slice %214 {offsets = [0, 8], sizes = [16, 8], strides = [1, 1]} : vector<16x96xf32> to vector<16x8xf32>
    %240 = vector.shape_cast %239 : vector<16x8xf32> to vector<2x8x8xf32>
    %241 = arith.truncf %240 : vector<2x8x8xf32> to vector<2x8x8xbf16>
    %242 = vector.extract_strided_slice %214 {offsets = [0, 40], sizes = [16, 8], strides = [1, 1]} : vector<16x96xf32> to vector<16x8xf32>
    %243 = vector.shape_cast %242 : vector<16x8xf32> to vector<2x8x8xf32>
    %244 = arith.truncf %243 : vector<2x8x8xf32> to vector<2x8x8xbf16>
    %245 = vector.extract_strided_slice %214 {offsets = [0, 72], sizes = [16, 8], strides = [1, 1]} : vector<16x96xf32> to vector<16x8xf32>
    %246 = vector.shape_cast %245 : vector<16x8xf32> to vector<2x8x8xf32>
    %247 = arith.truncf %246 : vector<2x8x8xf32> to vector<2x8x8xbf16>
    "tpu.trace_start"() <{level = 10 : i32, message = "bqd,bkd->bqk"}> : () -> ()
    %cst_112 = arith.constant dense<0.000000e+00> : vector<2x8x8xf32>
    %248 = tpu.matmul %241, %244, %cst_112 {dimension_numbers = #tpu.dot_dimension_numbers<[2], [2], [1], [1], [0, 0, 0, 1, 1, 1], [0], [0]>} : vector<2x8x8xbf16>, vector<2x8x8xbf16>, vector<2x8x8xf32> -> vector<2x8x8xf32>
    "tpu.trace_stop"() : () -> ()
    %cst_113 = arith.constant 0.353553385 : f32
    %249 = vector.broadcast %cst_113 : f32 to vector<2x8x8xf32>
    %250 = arith.mulf %248, %249 : vector<2x8x8xf32>
    %cst_114 = arith.constant dense<0xFF800000> : vector<2x8xf32>
    %251 = vector.multi_reduction <maximumf>, %250, %cst_114 [2] : vector<2x8x8xf32> to vector<2x8xf32>
    %252 = vector.shape_cast %251 : vector<2x8xf32> to vector<2x8x1xf32>
    %253 = vector.broadcast %252 : vector<2x8x1xf32> to vector<2x8x8xf32>
    %254 = arith.subf %250, %253 : vector<2x8x8xf32>
    %255 = math.exp %254 : vector<2x8x8xf32>
    %cst_115 = arith.constant dense<0.000000e+00> : vector<2x8xf32>
    %256 = vector.multi_reduction <add>, %255, %cst_115 [2] : vector<2x8x8xf32> to vector<2x8xf32>
    %257 = vector.shape_cast %256 : vector<2x8xf32> to vector<2x8x1xf32>
    %258 = tpu.reciprocal %257 {approx = true} : vector<2x8x1xf32> -> vector<2x8x1xf32>
    %259 = vector.broadcast %258 : vector<2x8x1xf32> to vector<2x8x8xf32>
    %260 = arith.mulf %255, %259 : vector<2x8x8xf32>
    %261 = arith.truncf %260 : vector<2x8x8xf32> to vector<2x8x8xbf16>
    "tpu.trace_start"() <{level = 10 : i32, message = "bqk,bkd->bqd"}> : () -> ()
    %cst_116 = arith.constant dense<0.000000e+00> : vector<2x8x8xf32>
    %262 = tpu.matmul %261, %247, %cst_116 {dimension_numbers = #tpu.dot_dimension_numbers<[2], [1], [1], [2], [0, 0, 0, 1, 1, 2], [0], [0]>} : vector<2x8x8xbf16>, vector<2x8x8xbf16>, vector<2x8x8xf32> -> vector<2x8x8xf32>
    "tpu.trace_stop"() : () -> ()
    %263 = vector.extract_strided_slice %214 {offsets = [0, 16], sizes = [16, 8], strides = [1, 1]} : vector<16x96xf32> to vector<16x8xf32>
    %264 = vector.shape_cast %263 : vector<16x8xf32> to vector<2x8x8xf32>
    %265 = arith.truncf %264 : vector<2x8x8xf32> to vector<2x8x8xbf16>
    %266 = vector.extract_strided_slice %214 {offsets = [0, 48], sizes = [16, 8], strides = [1, 1]} : vector<16x96xf32> to vector<16x8xf32>
    %267 = vector.shape_cast %266 : vector<16x8xf32> to vector<2x8x8xf32>
    %268 = arith.truncf %267 : vector<2x8x8xf32> to vector<2x8x8xbf16>
    %269 = vector.extract_strided_slice %214 {offsets = [0, 80], sizes = [16, 8], strides = [1, 1]} : vector<16x96xf32> to vector<16x8xf32>
    %270 = vector.shape_cast %269 : vector<16x8xf32> to vector<2x8x8xf32>
    %271 = arith.truncf %270 : vector<2x8x8xf32> to vector<2x8x8xbf16>
    "tpu.trace_start"() <{level = 10 : i32, message = "bqd,bkd->bqk"}> : () -> ()
    %cst_117 = arith.constant dense<0.000000e+00> : vector<2x8x8xf32>
    %272 = tpu.matmul %265, %268, %cst_117 {dimension_numbers = #tpu.dot_dimension_numbers<[2], [2], [1], [1], [0, 0, 0, 1, 1, 1], [0], [0]>} : vector<2x8x8xbf16>, vector<2x8x8xbf16>, vector<2x8x8xf32> -> vector<2x8x8xf32>
    "tpu.trace_stop"() : () -> ()
    %cst_118 = arith.constant 0.353553385 : f32
    %273 = vector.broadcast %cst_118 : f32 to vector<2x8x8xf32>
    %274 = arith.mulf %272, %273 : vector<2x8x8xf32>
    %cst_119 = arith.constant dense<0xFF800000> : vector<2x8xf32>
    %275 = vector.multi_reduction <maximumf>, %274, %cst_119 [2] : vector<2x8x8xf32> to vector<2x8xf32>
    %276 = vector.shape_cast %275 : vector<2x8xf32> to vector<2x8x1xf32>
    %277 = vector.broadcast %276 : vector<2x8x1xf32> to vector<2x8x8xf32>
    %278 = arith.subf %274, %277 : vector<2x8x8xf32>
    %279 = math.exp %278 : vector<2x8x8xf32>
    %cst_120 = arith.constant dense<0.000000e+00> : vector<2x8xf32>
    %280 = vector.multi_reduction <add>, %279, %cst_120 [2] : vector<2x8x8xf32> to vector<2x8xf32>
    %281 = vector.shape_cast %280 : vector<2x8xf32> to vector<2x8x1xf32>
    %282 = tpu.reciprocal %281 {approx = true} : vector<2x8x1xf32> -> vector<2x8x1xf32>
    %283 = vector.broadcast %282 : vector<2x8x1xf32> to vector<2x8x8xf32>
    %284 = arith.mulf %279, %283 : vector<2x8x8xf32>
    %285 = arith.truncf %284 : vector<2x8x8xf32> to vector<2x8x8xbf16>
    "tpu.trace_start"() <{level = 10 : i32, message = "bqk,bkd->bqd"}> : () -> ()
    %cst_121 = arith.constant dense<0.000000e+00> : vector<2x8x8xf32>
    %286 = tpu.matmul %285, %271, %cst_121 {dimension_numbers = #tpu.dot_dimension_numbers<[2], [1], [1], [2], [0, 0, 0, 1, 1, 2], [0], [0]>} : vector<2x8x8xbf16>, vector<2x8x8xbf16>, vector<2x8x8xf32> -> vector<2x8x8xf32>
    "tpu.trace_stop"() : () -> ()
    %287 = vector.extract_strided_slice %214 {offsets = [0, 24], sizes = [16, 8], strides = [1, 1]} : vector<16x96xf32> to vector<16x8xf32>
    %288 = vector.shape_cast %287 : vector<16x8xf32> to vector<2x8x8xf32>
    %289 = arith.truncf %288 : vector<2x8x8xf32> to vector<2x8x8xbf16>
    %290 = vector.extract_strided_slice %214 {offsets = [0, 56], sizes = [16, 8], strides = [1, 1]} : vector<16x96xf32> to vector<16x8xf32>
    %291 = vector.shape_cast %290 : vector<16x8xf32> to vector<2x8x8xf32>
    %292 = arith.truncf %291 : vector<2x8x8xf32> to vector<2x8x8xbf16>
    %293 = vector.extract_strided_slice %214 {offsets = [0, 88], sizes = [16, 8], strides = [1, 1]} : vector<16x96xf32> to vector<16x8xf32>
    %294 = vector.shape_cast %293 : vector<16x8xf32> to vector<2x8x8xf32>
    %295 = arith.truncf %294 : vector<2x8x8xf32> to vector<2x8x8xbf16>
    "tpu.trace_start"() <{level = 10 : i32, message = "bqd,bkd->bqk"}> : () -> ()
    %cst_122 = arith.constant dense<0.000000e+00> : vector<2x8x8xf32>
    %296 = tpu.matmul %289, %292, %cst_122 {dimension_numbers = #tpu.dot_dimension_numbers<[2], [2], [1], [1], [0, 0, 0, 1, 1, 1], [0], [0]>} : vector<2x8x8xbf16>, vector<2x8x8xbf16>, vector<2x8x8xf32> -> vector<2x8x8xf32>
    "tpu.trace_stop"() : () -> ()
    %cst_123 = arith.constant 0.353553385 : f32
    %297 = vector.broadcast %cst_123 : f32 to vector<2x8x8xf32>
    %298 = arith.mulf %296, %297 : vector<2x8x8xf32>
    %cst_124 = arith.constant dense<0xFF800000> : vector<2x8xf32>
    %299 = vector.multi_reduction <maximumf>, %298, %cst_124 [2] : vector<2x8x8xf32> to vector<2x8xf32>
    %300 = vector.shape_cast %299 : vector<2x8xf32> to vector<2x8x1xf32>
    %301 = vector.broadcast %300 : vector<2x8x1xf32> to vector<2x8x8xf32>
    %302 = arith.subf %298, %301 : vector<2x8x8xf32>
    %303 = math.exp %302 : vector<2x8x8xf32>
    %cst_125 = arith.constant dense<0.000000e+00> : vector<2x8xf32>
    %304 = vector.multi_reduction <add>, %303, %cst_125 [2] : vector<2x8x8xf32> to vector<2x8xf32>
    %305 = vector.shape_cast %304 : vector<2x8xf32> to vector<2x8x1xf32>
    %306 = tpu.reciprocal %305 {approx = true} : vector<2x8x1xf32> -> vector<2x8x1xf32>
    %307 = vector.broadcast %306 : vector<2x8x1xf32> to vector<2x8x8xf32>
    %308 = arith.mulf %303, %307 : vector<2x8x8xf32>
    %309 = arith.truncf %308 : vector<2x8x8xf32> to vector<2x8x8xbf16>
    "tpu.trace_start"() <{level = 10 : i32, message = "bqk,bkd->bqd"}> : () -> ()
    %cst_126 = arith.constant dense<0.000000e+00> : vector<2x8x8xf32>
    %310 = tpu.matmul %309, %295, %cst_126 {dimension_numbers = #tpu.dot_dimension_numbers<[2], [1], [1], [2], [0, 0, 0, 1, 1, 2], [0], [0]>} : vector<2x8x8xbf16>, vector<2x8x8xbf16>, vector<2x8x8xf32> -> vector<2x8x8xf32>
    "tpu.trace_stop"() : () -> ()
    %311 = tpu.concatenate %238, %262, %286, %310 in 2 : vector<2x8x8xf32>, vector<2x8x8xf32>, vector<2x8x8xf32>, vector<2x8x8xf32> -> vector<2x8x32xf32>
    %312 = vector.shape_cast %311 : vector<2x8x32xf32> to vector<16x32xf32>
    %313 = arith.truncf %312 : vector<16x32xf32> to vector<16x32xbf16>
    %cst_127 = arith.constant dense<0.000000e+00> : vector<16x32xf32>
    %314 = tpu.matmul %313, %192, %cst_127 {dimension_numbers = #tpu.dot_dimension_numbers<[1], [0], [0], [1], [0, 0, 1, 1], [], []>} : vector<16x32xbf16>, vector<32x32xbf16>, vector<16x32xf32> -> vector<16x32xf32>
    %315 = vector.broadcast %194 : vector<1x32xf32> to vector<16x32xf32>
    %316 = arith.addf %314, %315 : vector<16x32xf32>
    %317 = arith.addf %186, %316 : vector<16x32xf32>
    %cst_128 = arith.constant dense<0.000000e+00> : vector<16xf32>
    %318 = vector.multi_reduction <add>, %317, %cst_128 [1] : vector<16x32xf32> to vector<16xf32>
    %319 = vector.shape_cast %318 : vector<16xf32> to vector<16x1xf32>
    %cst_129 = arith.constant 3.200000e+01 : f32
    %320 = vector.broadcast %cst_129 : f32 to vector<16x1xf32>
    %321 = arith.divf %319, %320 : vector<16x1xf32>
    %322 = vector.broadcast %321 : vector<16x1xf32> to vector<16x32xf32>
    %323 = arith.subf %317, %322 : vector<16x32xf32>
    %324 = arith.mulf %323, %323 : vector<16x32xf32>
    %cst_130 = arith.constant dense<0.000000e+00> : vector<16xf32>
    %325 = vector.multi_reduction <add>, %324, %cst_130 [1] : vector<16x32xf32> to vector<16xf32>
    %326 = vector.shape_cast %325 : vector<16xf32> to vector<16x1xf32>
    %cst_131 = arith.constant 3.200000e+01 : f32
    %327 = vector.broadcast %cst_131 : f32 to vector<16x1xf32>
    %328 = arith.divf %326, %327 : vector<16x1xf32>
    %329 = vector.broadcast %321 : vector<16x1xf32> to vector<16x32xf32>
    %330 = arith.subf %317, %329 : vector<16x32xf32>
    %cst_132 = arith.constant 9.99999974E-6 : f32
    %331 = vector.broadcast %cst_132 : f32 to vector<16x1xf32>
    %332 = arith.addf %328, %331 : vector<16x1xf32>
    %333 = math.rsqrt %332 : vector<16x1xf32>
    %334 = vector.broadcast %333 : vector<16x1xf32> to vector<16x32xf32>
    %335 = arith.mulf %330, %334 : vector<16x32xf32>
    %336 = vector.broadcast %196 : vector<1x32xf32> to vector<16x32xf32>
    %337 = arith.mulf %335, %336 : vector<16x32xf32>
    %338 = vector.broadcast %198 : vector<1x32xf32> to vector<16x32xf32>
    %339 = arith.addf %337, %338 : vector<16x32xf32>
    %340 = arith.truncf %339 : vector<16x32xf32> to vector<16x32xbf16>
    %cst_133 = arith.constant dense<0.000000e+00> : vector<16x64xf32>
    %341 = tpu.matmul %340, %200, %cst_133 {dimension_numbers = #tpu.dot_dimension_numbers<[1], [0], [0], [1], [0, 0, 1, 1], [], []>} : vector<16x32xbf16>, vector<32x64xbf16>, vector<16x64xf32> -> vector<16x64xf32>
    %342 = vector.broadcast %202 : vector<1x64xf32> to vector<16x64xf32>
    %343 = arith.addf %341, %342 : vector<16x64xf32>
    %cst_134 = arith.constant 0.000000e+00 : f32
    %344 = vector.broadcast %cst_134 : f32 to vector<16x64xf32>
    %345 = arith.maximumf %343, %344 : vector<16x64xf32>
    %346 = arith.truncf %345 : vector<16x64xf32> to vector<16x64xbf16>
    %cst_135 = arith.constant dense<0.000000e+00> : vector<16x32xf32>
    %347 = tpu.matmul %346, %204, %cst_135 {dimension_numbers = #tpu.dot_dimension_numbers<[1], [0], [0], [1], [0, 0, 1, 1], [], []>} : vector<16x64xbf16>, vector<64x32xbf16>, vector<16x32xf32> -> vector<16x32xf32>
    %348 = vector.broadcast %206 : vector<1x32xf32> to vector<16x32xf32>
    %349 = arith.addf %347, %348 : vector<16x32xf32>
    %350 = arith.addf %339, %349 : vector<16x32xf32>
    %cst_136 = arith.constant dense<0.000000e+00> : vector<16xf32>
    %351 = vector.multi_reduction <add>, %350, %cst_136 [1] : vector<16x32xf32> to vector<16xf32>
    %352 = vector.shape_cast %351 : vector<16xf32> to vector<16x1xf32>
    %cst_137 = arith.constant 3.200000e+01 : f32
    %353 = vector.broadcast %cst_137 : f32 to vector<16x1xf32>
    %354 = arith.divf %352, %353 : vector<16x1xf32>
    %355 = vector.broadcast %354 : vector<16x1xf32> to vector<16x32xf32>
    %356 = arith.subf %350, %355 : vector<16x32xf32>
    %357 = arith.mulf %356, %356 : vector<16x32xf32>
    %cst_138 = arith.constant dense<0.000000e+00> : vector<16xf32>
    %358 = vector.multi_reduction <add>, %357, %cst_138 [1] : vector<16x32xf32> to vector<16xf32>
    %359 = vector.shape_cast %358 : vector<16xf32> to vector<16x1xf32>
    %cst_139 = arith.constant 3.200000e+01 : f32
    %360 = vector.broadcast %cst_139 : f32 to vector<16x1xf32>
    %361 = arith.divf %359, %360 : vector<16x1xf32>
    %362 = vector.broadcast %354 : vector<16x1xf32> to vector<16x32xf32>
    %363 = arith.subf %350, %362 : vector<16x32xf32>
    %cst_140 = arith.constant 9.99999974E-6 : f32
    %364 = vector.broadcast %cst_140 : f32 to vector<16x1xf32>
    %365 = arith.addf %361, %364 : vector<16x1xf32>
    %366 = math.rsqrt %365 : vector<16x1xf32>
    %367 = vector.broadcast %366 : vector<16x1xf32> to vector<16x32xf32>
    %368 = arith.mulf %363, %367 : vector<16x32xf32>
    %369 = vector.broadcast %208 : vector<1x32xf32> to vector<16x32xf32>
    %370 = arith.mulf %368, %369 : vector<16x32xf32>
    %371 = vector.broadcast %210 : vector<1x32xf32> to vector<16x32xf32>
    %372 = arith.addf %370, %371 : vector<16x32xf32>
    %373 = vector.shape_cast %372 : vector<16x32xf32> to vector<2x8x32xf32>
    %cst_141 = arith.constant dense<0.000000e+00> : vector<2x32xf32>
    %374 = vector.multi_reduction <add>, %373, %cst_141 [1] : vector<2x8x32xf32> to vector<2x32xf32>
    %cst_142 = arith.constant 8.000000e+00 : f32
    %375 = vector.broadcast %cst_142 : f32 to vector<2x32xf32>
    %376 = arith.divf %374, %375 : vector<2x32xf32>
    %cst_143 = arith.constant dense<0xFF800000> : vector<2xf32>
    %377 = vector.multi_reduction <maximumf>, %376, %cst_143 [1] : vector<2x32xf32> to vector<2xf32>
    %378 = vector.shape_cast %377 : vector<2xf32> to vector<2x1xf32>
    %379 = vector.broadcast %378 : vector<2x1xf32> to vector<2x32xf32>
    %380 = arith.subf %376, %379 : vector<2x32xf32>
    %381 = math.exp %380 : vector<2x32xf32>
    %cst_144 = arith.constant dense<0.000000e+00> : vector<2xf32>
    %382 = vector.multi_reduction <add>, %381, %cst_144 [1] : vector<2x32xf32> to vector<2xf32>
    %383 = vector.shape_cast %382 : vector<2xf32> to vector<2x1xf32>
    %384 = vector.broadcast %383 : vector<2x1xf32> to vector<2x32xf32>
    %385 = arith.divf %381, %384 : vector<2x32xf32>
    %c0_145 = arith.constant 0 : index
    %c0_146 = arith.constant 0 : index
    %386 = vector.load %arg13[%c0_145, %c0_146] : memref<2x32xf32, #tpu.memory_space<vmem>>, vector<2x32xf32>
    tpu.vector_store %arg13[%c0_145, %c0_146], %385 {strides = array<i32>} : memref<2x32xf32, #tpu.memory_space<vmem>>, vector<2x32xf32>,
    return
  }
}

</mosaic_0001>

<bundles_post_ra>
// kernel: tpu_custom_call.1
= control target key start
LH: loop header
LB: loop body
LE: loop exit
PB: predicated region body
PF: predicated region fallthrough
CT: control target
= control target key end

     0   :  { %18 = vsyncpa [#allocation3], 0  ;;  %s4255_s0 = inlined_call_operand.hbm [shape: f32[16,32], index: 0, kind: input, shape index: {}]   ;;  %s4256_s1 = inlined_call_operand.vmem [shape: bf16[2,32,96], index: 1, kind: input, shape index: {}]   ;;  %s4257_s2 = inlined_call_operand.vmem [shape: f32[2,1,96], index: 2, kind: input, shape index: {}]   ;;  %s4258_s3 = inlined_call_operand.vmem [shape: bf16[2,32,32], index: 3, kind: input, shape index: {}]   ;;  %s4259_s4 = inlined_call_operand.hbm [shape: f32[2,1,32], index: 4, kind: input, shape index: {}]   ;;  %s4260_s5 = inlined_call_operand.hbm [shape: f32[2,1,32], index: 5, kind: input, shape index: {}]   ;;  %s4261_s6 = inlined_call_operand.hbm [shape: f32[2,1,32], index: 6, kind: input, shape index: {}]   ;;  %s4262_s7 = inlined_call_operand.vmem [shape: bf16[2,32,64], index: 7, kind: input, shape index: {}]   ;;  %s4263_s8 = inlined_call_operand.hbm [shape: f32[2,1,64], index: 8, kind: input, shape index: {}]   ;;  %s4264_s9 = inlined_call_operand.vmem [shape: bf16[2,64,32], index: 9, kind: input, shape index: {}]   ;;  %s4265_s10 = inlined_call_operand.vmem [shape: f32[2,1,32], index: 10, kind: input, shape index: {}]   ;;  %s4266_s11 = inlined_call_operand.vmem [shape: f32[2,1,32], index: 11, kind: input, shape index: {}]   ;;  %s4267_s12 = inlined_call_operand.vmem [shape: f32[2,1,32], index: 12, kind: input, shape index: {}]   ;;  %s4268_s13 = inlined_call_operand.hbm [shape: f32[2,32], index: 13, kind: output, shape index: {}]  }
   0x1   :  { %19 = vsyncpa [#allocation6], 0 }
   0x2   :  { %20 = vsyncpa [#allocation9], 0 }
   0x3   :  { %21 = vsyncpa [#allocation4], 0  ;;  %s3568_s25 = smov [#allocation5]   ;;  %s3428_s29 = scalar_lea.hbm %s4259_s4, 32 }
   0x4   :  { %s45_s26 = sshll.u32 %s3568_s25, 4  ;;  %p3429_p0 = scmp.ne.s32.totalorder %s4259_s4, %s3428_s29  ;;  %s46_s26 = int_to_ptr.vmem [resolvable:$true] %s45_s26 }
   0x5   :  { %p3432_p1 = scmp.lt.u32.totalorder %s3428_s29, %s4259_s4 }
   0x7   :  { %p3434_p2 = pnand %p3432_p1, %p3429_p0 }
   0x9   :  { %3437 = shalt.err (!%p3434_p2)
}
   0xa   :  { %s3438_s17 = scalar_lea.vmem %s46_s26, 32  ;;  %p3443_p4 = scmp.lt.s32.totalorder %s46_s26, %s46_s26 }
   0xb   :  { %p3439_p3 = scmp.ne.s32.totalorder %s46_s26, %s3438_s17  ;;  %p3444_p5 = scmp.lt.s32.totalorder %s3438_s17, %s3438_s17 }
   0xd   :  { %p3445_p6 = por %p3444_p5, %p3443_p4 }
   0xf   :  { %p3446_p7 = pnand %p3445_p6, %p3439_p3 }
  0x11   :  { %3449 = shalt.err (!%p3446_p7)
}
  0x12   :  { %s3569_s18 = smov 16   ;;  %s3570_s19 = smov 1  }
  0x13   :  { %51 = dma.hbm_to_vmem [thread:$0]  %s4259_s4, 32, %s46_s26, [#allocation6], %s3569_s18, %s3569_s18, %s3570_s19  }
  0x14   :  { %s3571_s22 = smov [#allocation8]   ;;  %s3572_s24 = smov [#allocation2]  }
  0x15   :  { %s69_s23 = sshll.u32 %s3571_s22, 4  ;;  %s27_s25 = sshll.u32 %s3572_s24, 4  ;;  %s70_s23 = int_to_ptr.vmem [resolvable:$true] %s69_s23  ;;  %s28_s25 = int_to_ptr.vmem [resolvable:$true] %s27_s25 }
  0x16   :  { %s3450_s29 = scalar_lea.hbm %s4261_s6, 32 }
  0x17   :  { %p3451_p8 = scmp.ne.s32.totalorder %s4261_s6, %s3450_s29  ;;  %p3454_p9 = scmp.lt.u32.totalorder %s3450_s29, %s4261_s6 }
  0x19   :  { %p3456_p10 = pnand %p3454_p9, %p3451_p8 }
  0x1b   :  { %3459 = shalt.err (!%p3456_p10)
}
  0x1c   :  { %s3460_s4 = scalar_lea.vmem %s70_s23, 32  ;;  %p3465_p12 = scmp.lt.s32.totalorder %s70_s23, %s70_s23 }
  0x1d   :  { %p3461_p11 = scmp.ne.s32.totalorder %s70_s23, %s3460_s4  ;;  %p3466_p13 = scmp.lt.s32.totalorder %s3460_s4, %s3460_s4 }
  0x1f   :  { %p3467_p0 = por %p3466_p13, %p3465_p12 }
  0x21   :  { %p3468_p1 = pnand %p3467_p0, %p3461_p11 }
  0x23   :  { %3471 = shalt.err (!%p3468_p1)
}
  0x24   :  { %75 = dma.hbm_to_vmem [thread:$0]  %s4261_s6, 32, %s70_s23, [#allocation9], %s3569_s18, %s3569_s18, %s3570_s19  }
  0x25   :  { %s3472_s22 = scalar_lea.hbm %s4255_s0, 256 }
  0x26   :  { %p3473_p2 = scmp.ne.s32.totalorder %s4255_s0, %s3472_s22  ;;  %p3476_p3 = scmp.lt.u32.totalorder %s3472_s22, %s4255_s0 }
  0x28   :  { %p3478_p4 = pnand %p3476_p3, %p3473_p2 }
  0x2a   :  { %3481 = shalt.err (!%p3478_p4)
}
  0x2b   :  { %s3482_s30 = scalar_lea.vmem %s28_s25, 256  ;;  %p3487_p6 = scmp.lt.s32.totalorder %s28_s25, %s28_s25 }
  0x2c   :  { %p3483_p5 = scmp.ne.s32.totalorder %s28_s25, %s3482_s30  ;;  %p3488_p7 = scmp.lt.s32.totalorder %s3482_s30, %s3482_s30 }
  0x2e   :  { %p3489_p8 = por %p3488_p7, %p3487_p6 }
  0x30   :  { %p3490_p9 = pnand %p3489_p8, %p3483_p5 }
  0x32   :  { %3493 = shalt.err (!%p3490_p9)
}
  0x33   :  { %s3573_s6 = smov 128   ;;  %s3574_s23 = smov 8  }
  0x34   :  { %33 = dma.hbm_to_vmem [thread:$0]  %s4255_s0, 256, %s28_s25, [#allocation3], %s3573_s6, %s3573_s6, %s3574_s23  }
  0x35   :  { %s3575_s16 = smov [#allocation7]   ;;  %s3576_s26 = smov [#allocation10]  }
  0x36   :  { %s57_s4 = sshll.u32 %s3575_s16, 4  ;;  %s83_s17 = sshll.u32 %s3576_s26, 4  ;;  %s58_s4 = int_to_ptr.vmem [resolvable:$true] %s57_s4  ;;  %s84_s17 = int_to_ptr.vmem [resolvable:$true] %s83_s17 }
  0x37   :  { %s3494_s22 = scalar_lea.hbm %s4260_s5, 32 }
  0x38   :  { %p3495_p10 = scmp.ne.s32.totalorder %s4260_s5, %s3494_s22  ;;  %p3498_p11 = scmp.lt.u32.totalorder %s3494_s22, %s4260_s5 }
  0x3a   :  { %p3500_p12 = pnand %p3498_p11, %p3495_p10 }
  0x3c   :  { %3503 = shalt.err (!%p3500_p12)
}
  0x3d   :  { %s3504_s0 = scalar_lea.vmem %s58_s4, 32  ;;  %p3509_p0 = scmp.lt.s32.totalorder %s58_s4, %s58_s4 }
  0x3e   :  { %p3505_p13 = scmp.ne.s32.totalorder %s58_s4, %s3504_s0  ;;  %p3510_p1 = scmp.lt.s32.totalorder %s3504_s0, %s3504_s0 }
  0x40   :  { %p3511_p2 = por %p3510_p1, %p3509_p0 }
  0x42   :  { %p3512_p3 = pnand %p3511_p2, %p3505_p13 }
  0x44   :  { %3515 = shalt.err (!%p3512_p3)
}
  0x45   :  { %63 = dma.hbm_to_vmem [thread:$0]  %s4260_s5, 32, %s58_s4, [#allocation6], %s3569_s18, %s3569_s18, %s3570_s19  }
  0x46   :  { %s3516_s15 = scalar_lea.hbm %s4263_s8, 32 }
  0x47   :  { %p3517_p4 = scmp.ne.s32.totalorder %s4263_s8, %s3516_s15  ;;  %p3520_p5 = scmp.lt.u32.totalorder %s3516_s15, %s4263_s8 }
  0x49   :  { %p3522_p6 = pnand %p3520_p5, %p3517_p4 }
  0x4b   :  { %3525 = shalt.err (!%p3522_p6)
}
  0x4c   :  { %s3526_s22 = scalar_lea.vmem %s84_s17, 32  ;;  %p3531_p8 = scmp.lt.s32.totalorder %s84_s17, %s84_s17 }
  0x4d   :  { %p3527_p7 = scmp.ne.s32.totalorder %s84_s17, %s3526_s22  ;;  %p3532_p9 = scmp.lt.s32.totalorder %s3526_s22, %s3526_s22 }
  0x4f   :  { %p3533_p10 = por %p3532_p9, %p3531_p8 }
  0x51   :  { %p3534_p11 = pnand %p3533_p10, %p3527_p7 }
  0x53   :  { %3537 = shalt.err (!%p3534_p11)
}
  0x54   :  { %89 = dma.hbm_to_vmem [thread:$0]  %s4263_s8, 32, %s84_s17, [#allocation9], %s3569_s18, %s3569_s18, %s3570_s19  }
  0x55   :  { %3560 = dma.done.wait [#allocation3], 256  }
  0x56   :  { %3561 = vsyncadd [#allocation3], 4294967040 }
  0x57   :  { %3562 = dma.done.wait [#allocation6], 64  }
  0x58   :  { %3563 = vsyncadd [#allocation6], 4294967232 }
  0x59   :  { %3564 = dma.done.wait [#allocation9], 64  }
  0x5a   :  { %3565 = vsyncadd [#allocation9], 4294967232  ;;  %v3577_v0 = vmov 0.0   ;;  %vm3578_vm0 = vmmov 0   ;;  %v3320_v1 = vld [vmem:[%s4256_s1] sm:$0xff]   ;;  %v3321_v2 = vld [vmem:[%s4256_s1 + $0x8] sm:$0xff]  }
  0x5b   :  { %3002 = vmatprep.subr.bf16.mxu1 %v3577_v0  ;;  %3006 = vmatprep.mubr.msk.bf16.mxu1 %vm3578_vm0, %v3577_v0  ;;  %v3747_v3 = vld [vmem:[#allocation2] sm:$0xff]  ;;  %v3749_v4 = vld [vmem:[#allocation2 + $0x8] sm:$0xff]  ;;  %vm163_vm1 = vcmask 261120   ;;  %s3579_s29 = smov 96   ;;  %vm213_vm2 = vcmask 64512   ;;  %s3580_s0 = smov 64  }
  0x5c   :  { %3016 = vmatprep.subr.bf16.mxu0 %v3577_v0  ;;  %3018 = vmatprep.mubr.msk.bf16.mxu0 %vm3578_vm0, %v3577_v0  ;;  %v144_v5 = vpack.c.bf16 %v3749_v4, %v3747_v3  ;;  %v2810_v6 = vld [vmem:[%s4257_s2] ss:$0 sm:$0xff]  ;;  %s3581_s25 = smov 88   ;;  %vm340_vm3 = vcmask 1043456   ;;  %s3582_s30 = smov 120   ;;  %vm1124_vm4 = vcmask 130048  }
  0x5d   :  { %3003 = vmatpush3.bf16.msra.mxu1 %v3320_v1  ;;  %s3583_s6 = smov 56   ;;  %s3584_s14 = smov 80   ;;  %vm1127_vm5 = vcmask 195584   ;;  %vm1334_vm6 = vcmask 523264   ;;  %vm2754_vm7 = vcmask 1041409   ;;  %vm2757_vm8 = vcmask 254976  }
  0x5e   :  { %3004 = vmatprep.subr.bf16.mxu1 %v3577_v0  ;;  %s3585_s15 = smov 112   ;;  %s3586_s16 = smov 48  }
  0x5f   :  { %s3587_s26 = smov 72   ;;  %s3588_s20 = smov 104  }
  0x60   :  { %s3589_s21 = smov 40   ;;  %s3590_s8 = smov 24  }
  0x61   :  { %3005 = vmatpush3.bf16.msra.mxu1 %v3321_v2 }
  0x62   :  { %3010 = vmatprep.subr.bf16.mxu1 %v3577_v0 }
  0x64   :  { %3007 = vmatmul.mubr.msk.bf16.vlgmr.msra.gmra.mrb[0].mxu1 %vm163_vm1, %v144_v5 }
  0x65   :  { %3012 = vmatprep.mubr.msk.bf16.mxu1 %vm3578_vm0, %v3577_v0 }
 0x137   :  { %v201_v7 = vpop.f32.mrb[0].mxu1 }
 0x138   :  { %v202_v8 = vadd.f32 %v2810_v6, %v201_v7  ;;  %v3008_v9 = vpop.f32.mrb[1].mxu1 }
 0x139   :  { %v204_v10 = vpop.f32.mrb[2].mxu1 }
 0x13a   :  { %v3761_v11 = vpack.c.bf16 %v202_v8, %v202_v8  ;;  %v205_v12 = vadd.f32 %v2810_v6, %v204_v10  ;;  %v3009_v13 = vpop.f32.mrb[3].mxu1 }
 0x13c   :  { %211 = vrot.lane.b32.xlu0 %v3761_v11, %s3579_s29  ;;  %v3765_v14 = vpack.c.bf16 %v205_v12, %v205_v12 }
 0x140   :  { %261 = vrot.lane.b32.xlu0 %v3765_v14, %s3579_s29 }
 0x1ae   :  { %v212_v15 = vpop.permute.xlu0 %211 }
 0x1af   :  { %v218_v16 = vsel %vm213_vm2, %v212_v15, 0 }
 0x1b0   :  { %3011 = vmatpush3.bf16.xpose.msra.mxu1 %v218_v16 }
 0x1b1   :  { %3022 = vmatprep.subr.bf16.mxu1 %v3577_v0 }
 0x1b2   :  { %v262_v17 = vpop.permute.xlu0 %261 }
 0x1b3   :  { %v267_v18 = vsel %vm213_vm2, %v262_v17, 0 }
 0x1b4   :  { %3017 = vmatpush3.bf16.xpose.msra.mxu0 %v267_v18 }
 0x1b5   :  { %3028 = vmatprep.subr.bf16.mxu0 %v3577_v0 }
 0x1b7   :  { %3013 = vmatmul.mubr.msk.bf16.vlgmr.msra.gmra.mrb[4].mxu1 %vm213_vm2, %v3761_v11 }
 0x1b8   :  { %3024 = vmatprep.mubr.msk.bf16.mxu1 %vm3578_vm0, %v3577_v0 }
 0x1bb   :  { %3019 = vmatmul.mubr.msk.bf16.vlgmr.msra.gmra.mrb[0].mxu0 %vm213_vm2, %v3765_v14 }
 0x1bc   :  { %3030 = vmatprep.mubr.msk.bf16.mxu0 %vm3578_vm0, %v3577_v0 }
 0x28a   :  { %v254_v19 = vpop.f32.mrb[4].mxu1 }
 0x28b   :  { %v309_v20 = vmul.f32 0.35355338, %v254_v19  ;;  %v3014_v21 = vpop.f32.mrb[5].mxu1 }
 0x28c   :  { %v257_v22 = vpop.f32.mrb[6].mxu1 }
 0x28d   :  { %v3015_v23 = vpop.f32.mrb[7].mxu1  ;;  %v311_v24 = vsel %vm213_vm2, %v309_v20, -inf }
 0x28e   :  { %v303_v25 = vpop.f32.mrb[0].mxu0  ;;  %312 = vmax.xlane.f32.xlu1 %v311_v24 }
 0x28f   :  { %v310_v26 = vmul.f32 0.35355338, %v303_v25  ;;  %v3020_v27 = vpop.f32.mrb[1].mxu0 }
 0x290   :  { %v306_v28 = vpop.f32.mrb[2].mxu0 }
 0x291   :  { %v3021_v29 = vpop.f32.mrb[3].mxu0  ;;  %v314_v30 = vsel %vm213_vm2, %v310_v26, -inf }
 0x292   :  { %315 = vmax.xlane.f32.xlu1 %v314_v30 }
 0x2a3   :  { %335 = vrot.lane.b32.xlu1 %v3761_v11, %s3580_s0 }
 0x2a7   :  { %384 = vrot.lane.b32.xlu1 %v3765_v14, %s3580_s0 }
 0x2ab   :  { %434 = vrot.lane.b32.xlu1 %v3761_v11, %s3581_s25 }
 0x31b   :  { %v313_v31 = vpop.xlane.xlu1 %312 }
 0x31c   :  { %v317_v32 = vsub.f32 %v309_v20, %v313_v31 }
 0x31e   :  { %v319_v33 = vmul.f32 1.442695, %v317_v32 }
 0x31f   :  { %v316_v34 = vpop.xlane.xlu1 %315 }
 0x320   :  { %3340 = vpow2.f32 %v319_v33  ;;  %v318_v35 = vsub.f32 %v310_v26, %v316_v34 }
 0x322   :  { %v321_v36 = vmul.f32 1.442695, %v318_v35 }
 0x323   :  { %v336_v37 = vpop.permute.xlu1 %335 }
 0x324   :  { %3342 = vpow2.f32 %v321_v36  ;;  %v342_v38 = vsel %vm340_vm3, %v336_v37, 0 }
 0x325   :  { %3023 = vmatpush3.bf16.msra.mxu1 %v342_v38 }
 0x326   :  { %3034 = vmatprep.subr.bf16.mxu1 %v3577_v0 }
 0x327   :  { %v385_v39 = vpop.permute.xlu1 %384 }
 0x328   :  { %v390_v40 = vsel %vm340_vm3, %v385_v39, 0 }
 0x329   :  { %3029 = vmatpush3.bf16.msra.mxu0 %v390_v40 }
 0x32a   :  { %v3341_v41 = vpop.eup %3340  ;;  %3040 = vmatprep.subr.bf16.mxu0 %v3577_v0 }
 0x32b   :  { %v323_v42 = vsel %vm213_vm2, %v3341_v41, 0.0  ;;  %v435_v45 = vpop.permute.xlu1 %434 }
 0x32c   :  { %324 = vadd.xlane.f32.xlu0 %v323_v42  ;;  %v440_v52 = vsel %vm213_vm2, %v435_v45, 0 }
 0x32e   :  { %v3343_v43 = vpop.eup %3342 }
 0x32f   :  { %v326_v44 = vsel %vm213_vm2, %v3343_v43, 0.0 }
 0x330   :  { %327 = vadd.xlane.f32.xlu1 %v326_v44 }
 0x341   :  { %484 = vrot.lane.b32.xlu1 %v3765_v14, %s3581_s25 }
 0x342   :  { %432 = vrot.lane.b32.xlu0 %v3761_v11, %s3582_s30 }
 0x345   :  { %482 = vrot.lane.b32.xlu1 %v3765_v14, %s3582_s30 }
 0x3b9   :  { %v325_v46 = vpop.xlane.xlu0 %324 }
 0x3ba   :  { %3344 = vrcp.f32 %v325_v46 }
 0x3bd   :  { %v328_v47 = vpop.xlane.xlu1 %327  ;;  %v433_v57 = vpop.permute.xlu0 %432 }
 0x3be   :  { %3346 = vrcp.f32 %v328_v47 }
 0x3c1   :  { %v485_v54 = vpop.permute.xlu1 %484 }
 0x3c2   :  { %v490_v56 = vsel %vm213_vm2, %v485_v54, 0 }
 0x3c4   :  { %v3345_v48 = vpop.eup %3344 }
 0x3c5   :  { %v331_v49 = vmul.f32 %v3345_v48, %v3341_v41  ;;  %v483_v58 = vpop.permute.xlu1 %482 }
 0x3c7   :  { %v333_v50 = vpack.c.bf16 %v331_v49, %v331_v49 }
 0x3c8   :  { %v3347_v51 = vpop.eup %3346 }
 0x3c9   :  { %v332_v53 = vmul.f32 %v3347_v51, %v3343_v43  ;;  %3025 = vmatmul.mubr.msk.bf16.vlgmr.msra.gmra.mrb[8].mxu1 %vm213_vm2, %v333_v50 }
 0x3ca   :  { %3035 = vmatpush3.bf16.xpose.msra.mxu1 %v440_v52  ;;  %3036 = vmatprep.mubr.msk.bf16.mxu1 %vm3578_vm0, %v3577_v0 }
 0x3cb   :  { %v334_v55 = vpack.c.bf16 %v332_v53, %v332_v53  ;;  %3046 = vmatprep.subr.bf16.mxu1 %v3577_v0 }
 0x3cd   :  { %3031 = vmatmul.mubr.msk.bf16.vlgmr.msra.gmra.mrb[4].mxu0 %vm213_vm2, %v334_v55 }
 0x3ce   :  { %3041 = vmatpush3.bf16.xpose.msra.mxu0 %v490_v56  ;;  %3042 = vmatprep.mubr.msk.bf16.mxu0 %vm3578_vm0, %v3577_v0 }
 0x3cf   :  { %3052 = vmatprep.subr.bf16.mxu0 %v3577_v0 }
 0x3d1   :  { %3037 = vmatmul.mubr.msk.bf16.vlgmr.msra.gmra.mrb[12].mxu1 %vm213_vm2, %v433_v57 }
 0x3d2   :  { %3048 = vmatprep.mubr.msk.bf16.mxu1 %vm3578_vm0, %v3577_v0 }
 0x3d5   :  { %3043 = vmatmul.mubr.msk.bf16.vlgmr.msra.gmra.mrb[8].mxu0 %vm213_vm2, %v483_v58 }
 0x3d6   :  { %3054 = vmatprep.mubr.msk.bf16.mxu0 %vm3578_vm0, %v3577_v0 }
 0x49c   :  { %v3817_v59 = vpop.f32.mrb[8].mxu1 }
 0x49d   :  { %v3026_v60 = vpop.f32.mrb[9].mxu1 }
 0x49e   :  { %v381_v61 = vpop.f32.mrb[10].mxu1 }
 0x49f   :  { %v3027_v62 = vpop.f32.mrb[11].mxu1 }
 0x4a0   :  { %v3819_v63 = vpop.f32.mrb[4].mxu0 }
 0x4a1   :  { %v3032_v1 = vpop.f32.mrb[5].mxu0 }
 0x4a2   :  { %v429_v2 = vpop.f32.mrb[6].mxu0 }
 0x4a3   :  { %v3033_v5 = vpop.f32.mrb[7].mxu0 }
 0x4a4   :  { %v476_v6 = vpop.f32.mrb[12].mxu1 }
 0x4a5   :  { %v532_v7 = vmul.f32 0.35355338, %v476_v6  ;;  %v3038_v8 = vpop.f32.mrb[13].mxu1 }
 0x4a6   :  { %v479_v9 = vpop.f32.mrb[14].mxu1 }
 0x4a7   :  { %v3039_v10 = vpop.f32.mrb[15].mxu1  ;;  %v534_v12 = vsel %vm213_vm2, %v532_v7, -inf }
 0x4a8   :  { %v526_v13 = vpop.f32.mrb[8].mxu0  ;;  %535 = vmax.xlane.f32.xlu1 %v534_v12 }
 0x4a9   :  { %v533_v15 = vmul.f32 0.35355338, %v526_v13  ;;  %v3044_v16 = vpop.f32.mrb[9].mxu0 }
 0x4aa   :  { %v529_v17 = vpop.f32.mrb[10].mxu0 }
 0x4ab   :  { %v3045_v18 = vpop.f32.mrb[11].mxu0  ;;  %v537_v19 = vsel %vm213_vm2, %v533_v15, -inf }
 0x4ac   :  { %538 = vmax.xlane.f32.xlu0 %v537_v19 }
 0x4b9   :  { %558 = vrot.lane.b32.xlu1 %v3761_v11, %s3583_s6 }
 0x4bd   :  { %656 = vrot.lane.b32.xlu1 %v3761_v11, %s3584_s14 }
 0x4c2   :  { %606 = vrot.lane.b32.xlu0 %v3765_v14, %s3583_s6 }
 0x4c6   :  { %654 = vrot.lane.b32.xlu0 %v3761_v11, %s3585_s15 }
 0x535   :  { %v536_v20 = vpop.xlane.xlu1 %535 }
 0x536   :  { %v540_v21 = vsub.f32 %v532_v7, %v536_v20 }
 0x538   :  { %v542_v22 = vmul.f32 1.442695, %v540_v21 }
 0x539   :  { %v539_v23 = vpop.xlane.xlu0 %538  ;;  %v559_v24 = vpop.permute.xlu1 %558 }
 0x53a   :  { %3348 = vpow2.f32 %v542_v22  ;;  %v541_v25 = vsub.f32 %v533_v15, %v539_v23  ;;  %v564_v26 = vsel %vm340_vm3, %v559_v24, 0 }
 0x53b   :  { %3047 = vmatpush3.bf16.msra.mxu1 %v564_v26 }
 0x53c   :  { %v544_v27 = vmul.f32 1.442695, %v541_v25  ;;  %3058 = vmatprep.subr.bf16.mxu1 %v3577_v0 }
 0x53d   :  { %v607_v28 = vpop.permute.xlu0 %606  ;;  %v657_v34 = vpop.permute.xlu1 %656 }
 0x53e   :  { %3350 = vpow2.f32 %v544_v27  ;;  %v612_v29 = vsel %vm340_vm3, %v607_v28, 0  ;;  %v662_v41 = vsel %vm213_vm2, %v657_v34, 0 }
 0x53f   :  { %3053 = vmatpush3.bf16.msra.mxu0 %v612_v29 }
 0x540   :  { %3064 = vmatprep.subr.bf16.mxu0 %v3577_v0 }
 0x541   :  { %v655_v46 = vpop.permute.xlu0 %654 }
 0x544   :  { %v3349_v30 = vpop.eup %3348 }
 0x545   :  { %v546_v31 = vsel %vm213_vm2, %v3349_v30, 0.0 }
 0x546   :  { %547 = vadd.xlane.f32.xlu1 %v546_v31 }
 0x548   :  { %v3351_v32 = vpop.eup %3350 }
 0x549   :  { %v549_v33 = vsel %vm213_vm2, %v3351_v32, 0.0 }
 0x54a   :  { %550 = vadd.xlane.f32.xlu1 %v549_v33 }
 0x55b   :  { %706 = vrot.lane.b32.xlu1 %v3765_v14, %s3584_s14 }
 0x55f   :  { %704 = vrot.lane.b32.xlu1 %v3765_v14, %s3585_s15 }
 0x5d3   :  { %v548_v35 = vpop.xlane.xlu1 %547 }
 0x5d4   :  { %3352 = vrcp.f32 %v548_v35 }
 0x5d7   :  { %v551_v36 = vpop.xlane.xlu1 %550 }
 0x5d8   :  { %3354 = vrcp.f32 %v551_v36 }
 0x5db   :  { %v707_v43 = vpop.permute.xlu1 %706 }
 0x5dc   :  { %v712_v45 = vsel %vm213_vm2, %v707_v43, 0 }
 0x5de   :  { %v3353_v37 = vpop.eup %3352 }
 0x5df   :  { %v554_v38 = vmul.f32 %v3353_v37, %v3349_v30  ;;  %v705_v47 = vpop.permute.xlu1 %704 }
 0x5e1   :  { %v556_v39 = vpack.c.bf16 %v554_v38, %v554_v38 }
 0x5e2   :  { %v3355_v40 = vpop.eup %3354 }
 0x5e3   :  { %v555_v42 = vmul.f32 %v3355_v40, %v3351_v32  ;;  %3049 = vmatmul.mubr.msk.bf16.vlgmr.msra.gmra.mrb[16].mxu1 %vm213_vm2, %v556_v39 }
 0x5e4   :  { %3059 = vmatpush3.bf16.xpose.msra.mxu1 %v662_v41  ;;  %3060 = vmatprep.mubr.msk.bf16.mxu1 %vm3578_vm0, %v3577_v0 }
 0x5e5   :  { %v557_v44 = vpack.c.bf16 %v555_v42, %v555_v42  ;;  %3070 = vmatprep.subr.bf16.mxu1 %v3577_v0 }
 0x5e7   :  { %3055 = vmatmul.mubr.msk.bf16.vlgmr.msra.gmra.mrb[12].mxu0 %vm213_vm2, %v557_v44 }
 0x5e8   :  { %3065 = vmatpush3.bf16.xpose.msra.mxu0 %v712_v45  ;;  %3066 = vmatprep.mubr.msk.bf16.mxu0 %vm3578_vm0, %v3577_v0 }
 0x5e9   :  { %3076 = vmatprep.subr.bf16.mxu0 %v3577_v0 }
 0x5eb   :  { %3061 = vmatmul.mubr.msk.bf16.vlgmr.msra.gmra.mrb[20].mxu1 %vm213_vm2, %v655_v46 }
 0x5ec   :  { %3072 = vmatprep.mubr.msk.bf16.mxu1 %vm3578_vm0, %v3577_v0 }
 0x5ef   :  { %3067 = vmatmul.mubr.msk.bf16.vlgmr.msra.gmra.mrb[16].mxu0 %vm213_vm2, %v705_v47 }
 0x5f0   :  { %3078 = vmatprep.mubr.msk.bf16.mxu0 %vm3578_vm0, %v3577_v0 }
 0x6b6   :  { %v3857_v48 = vpop.f32.mrb[16].mxu1 }
 0x6b7   :  { %v3050_v49 = vpop.f32.mrb[17].mxu1 }
 0x6b8   :  { %v603_v50 = vpop.f32.mrb[18].mxu1 }
 0x6b9   :  { %v3051_v51 = vpop.f32.mrb[19].mxu1 }
 0x6ba   :  { %v3859_v52 = vpop.f32.mrb[12].mxu0 }
 0x6bb   :  { %v3290_v53 = vpack.i.bf16 %v3859_v52, %v3857_v48  ;;  %v3056_v54 = vpop.f32.mrb[13].mxu0 }
 0x6bc   :  { %v651_v55 = vpop.f32.mrb[14].mxu0 }
 0x6bd   :  { %v3057_v56 = vpop.f32.mrb[15].mxu0 }
 0x6be   :  { %v698_v57 = vpop.f32.mrb[20].mxu1 }
 0x6bf   :  { %v754_v58 = vmul.f32 0.35355338, %v698_v57  ;;  %v3062_v60 = vpop.f32.mrb[21].mxu1 }
 0x6c0   :  { %v701_v61 = vpop.f32.mrb[22].mxu1 }
 0x6c1   :  { %v3063_v62 = vpop.f32.mrb[23].mxu1  ;;  %v756_v1 = vsel %vm213_vm2, %v754_v58, -inf }
 0x6c2   :  { %v748_v2 = vpop.f32.mrb[16].mxu0  ;;  %757 = vmax.xlane.f32.xlu0 %v756_v1 }
 0x6c3   :  { %v755_v5 = vmul.f32 0.35355338, %v748_v2  ;;  %v3068_v6 = vpop.f32.mrb[17].mxu0 }
 0x6c4   :  { %v751_v7 = vpop.f32.mrb[18].mxu0 }
 0x6c5   :  { %v3069_v8 = vpop.f32.mrb[19].mxu0  ;;  %v759_v9 = vsel %vm213_vm2, %v755_v5, -inf }
 0x6c6   :  { %760 = vmax.xlane.f32.xlu1 %v759_v9 }
 0x6d7   :  { %780 = vrot.lane.b32.xlu1 %v3761_v11, %s3586_s16 }
 0x6db   :  { %878 = vrot.lane.b32.xlu1 %v3761_v11, %s3587_s26 }
 0x6df   :  { %928 = vrot.lane.b32.xlu1 %v3765_v14, %s3587_s26 }
 0x6e3   :  { %926 = vrot.lane.b32.xlu1 %v3765_v14, %s3588_s20 }
 0x74f   :  { %v758_v10 = vpop.xlane.xlu0 %757 }
 0x750   :  { %v762_v12 = vsub.f32 %v754_v58, %v758_v10 }
 0x752   :  { %v764_v13 = vmul.f32 1.442695, %v762_v12 }
 0x753   :  { %v761_v15 = vpop.xlane.xlu1 %760 }
 0x754   :  { %3356 = vpow2.f32 %v764_v13  ;;  %v763_v16 = vsub.f32 %v755_v5, %v761_v15 }
 0x756   :  { %v766_v17 = vmul.f32 1.442695, %v763_v16 }
 0x757   :  { %v781_v18 = vpop.permute.xlu1 %780 }
 0x758   :  { %3358 = vpow2.f32 %v766_v17  ;;  %v786_v19 = vsel %vm340_vm3, %v781_v18, 0 }
 0x759   :  { %3071 = vmatpush3.bf16.msra.mxu1 %v786_v19 }
 0x75a   :  { %3082 = vmatprep.subr.bf16.mxu1 %v3577_v0 }
 0x75b   :  { %v879_v29 = vpop.permute.xlu1 %878 }
 0x75c   :  { %v884_v33 = vsel %vm213_vm2, %v879_v29, 0 }
 0x75e   :  { %v3357_v20 = vpop.eup %3356 }
 0x75f   :  { %v768_v21 = vsel %vm213_vm2, %v3357_v20, 0.0  ;;  %v929_v35 = vpop.permute.xlu1 %928 }
 0x760   :  { %769 = vadd.xlane.f32.xlu0 %v768_v21  ;;  %v934_v37 = vsel %vm213_vm2, %v929_v35, 0 }
 0x762   :  { %v3359_v22 = vpop.eup %3358 }
 0x763   :  { %v771_v23 = vsel %vm213_vm2, %v3359_v22, 0.0  ;;  %v927_v39 = vpop.permute.xlu1 %926 }
 0x764   :  { %772 = vadd.xlane.f32.xlu0 %v771_v23 }
 0x77a   :  { %828 = vrot.lane.b32.xlu0 %v3765_v14, %s3586_s16 }
 0x77e   :  { %876 = vrot.lane.b32.xlu0 %v3761_v11, %s3588_s20 }
 0x7ed   :  { %v770_v24 = vpop.xlane.xlu0 %769 }
 0x7ee   :  { %3360 = vrcp.f32 %v770_v24  ;;  %v3322_v24 = vld [vmem:[%s4258_s3] sm:$0xff]  }
 0x7f1   :  { %v773_v25 = vpop.xlane.xlu0 %772 }
 0x7f2   :  { %3362 = vrcp.f32 %v773_v25  ;;  %v3323_v25 = vld [vmem:[%s4258_s3 + $0x8] sm:$0xff]  }
 0x7f5   :  { %v829_v26 = vpop.permute.xlu0 %828 }
 0x7f6   :  { %v834_v27 = vsel %vm340_vm3, %v829_v26, 0 }
 0x7f7   :  { %3077 = vmatpush3.bf16.msra.mxu0 %v834_v27 }
 0x7f8   :  { %v3361_v28 = vpop.eup %3360  ;;  %3088 = vmatprep.subr.bf16.mxu0 %v3577_v0 }
 0x7f9   :  { %v776_v30 = vmul.f32 %v3361_v28, %v3357_v20  ;;  %v877_v38 = vpop.permute.xlu0 %876 }
 0x7fb   :  { %v778_v31 = vpack.c.bf16 %v776_v30, %v776_v30 }
 0x7fc   :  { %v3363_v32 = vpop.eup %3362 }
 0x7fd   :  { %v777_v34 = vmul.f32 %v3363_v32, %v3359_v22  ;;  %3073 = vmatmul.mubr.msk.bf16.vlgmr.msra.gmra.mrb[24].mxu1 %vm213_vm2, %v778_v31 }
 0x7fe   :  { %3083 = vmatpush3.bf16.xpose.msra.mxu1 %v884_v33  ;;  %3084 = vmatprep.mubr.msk.bf16.mxu1 %vm3578_vm0, %v3577_v0 }
 0x7ff   :  { %v779_v36 = vpack.c.bf16 %v777_v34, %v777_v34  ;;  %3094 = vmatprep.subr.bf16.mxu1 %v3577_v0 }
 0x801   :  { %3079 = vmatmul.mubr.msk.bf16.vlgmr.msra.gmra.mrb[20].mxu0 %vm213_vm2, %v779_v36 }
 0x802   :  { %3089 = vmatpush3.bf16.xpose.msra.mxu0 %v934_v37  ;;  %3090 = vmatprep.mubr.msk.bf16.mxu0 %vm3578_vm0, %v3577_v0 }
 0x803   :  { %3100 = vmatprep.subr.bf16.mxu0 %v3577_v0 }
 0x805   :  { %3085 = vmatmul.mubr.msk.bf16.vlgmr.msra.gmra.mrb[28].mxu1 %vm213_vm2, %v877_v38 }
 0x806   :  { %3096 = vmatprep.mubr.msk.bf16.mxu1 %vm3578_vm0, %v3577_v0 }
 0x809   :  { %3091 = vmatmul.mubr.msk.bf16.vlgmr.msra.gmra.mrb[24].mxu0 %vm213_vm2, %v927_v39 }
 0x80a   :  { %3102 = vmatprep.mubr.msk.bf16.mxu0 %vm3578_vm0, %v3577_v0 }
 0x8d0   :  { %v822_v40 = vpop.f32.mrb[24].mxu1 }
 0x8d1   :  { %v3074_v41 = vpop.f32.mrb[25].mxu1 }
 0x8d2   :  { %v825_v42 = vpop.f32.mrb[26].mxu1 }
 0x8d3   :  { %v3075_v43 = vpop.f32.mrb[27].mxu1 }
 0x8d4   :  { %v870_v44 = vpop.f32.mrb[20].mxu0 }
 0x8d5   :  { %v3295_v45 = vpack.i.bf16 %v870_v44, %v822_v40  ;;  %v3080_v46 = vpop.f32.mrb[21].mxu0 }
 0x8d6   :  { %v873_v47 = vpop.f32.mrb[22].mxu0 }
 0x8d7   :  { %v3081_v49 = vpop.f32.mrb[23].mxu0 }
 0x8d8   :  { %v920_v50 = vpop.f32.mrb[28].mxu1 }
 0x8d9   :  { %v976_v51 = vmul.f32 0.35355338, %v920_v50  ;;  %v3086_v54 = vpop.f32.mrb[29].mxu1 }
 0x8da   :  { %v923_v55 = vpop.f32.mrb[30].mxu1 }
 0x8db   :  { %v3087_v56 = vpop.f32.mrb[31].mxu1  ;;  %v978_v57 = vsel %vm213_vm2, %v976_v51, -inf }
 0x8dc   :  { %v970_v58 = vpop.f32.mrb[24].mxu0  ;;  %979 = vmax.xlane.f32.xlu0 %v978_v57 }
 0x8dd   :  { %v977_v60 = vmul.f32 0.35355338, %v970_v58  ;;  %v3092_v61 = vpop.f32.mrb[25].mxu0 }
 0x8de   :  { %v973_v62 = vpop.f32.mrb[26].mxu0 }
 0x8df   :  { %v3093_v1 = vpop.f32.mrb[27].mxu0  ;;  %v981_v2 = vsel %vm213_vm2, %v977_v60, -inf }
 0x8e0   :  { %982 = vmax.xlane.f32.xlu1 %v981_v2 }
 0x8f1   :  { %1002 = vrot.lane.b32.xlu1 %v3761_v11, %s3589_s21 }
 0x8f5   :  { %3291 = vrot.lane.b32.xlu1 %v3290_v53, %s3574_s23 }
 0x8f9   :  { %3296 = vrot.lane.b32.xlu1 %v3295_v45, %s3569_s18 }
 0x969   :  { %v980_v5 = vpop.xlane.xlu0 %979 }
 0x96a   :  { %v984_v6 = vsub.f32 %v976_v51, %v980_v5 }
 0x96c   :  { %v986_v7 = vmul.f32 1.442695, %v984_v6 }
 0x96d   :  { %v983_v8 = vpop.xlane.xlu1 %982 }
 0x96e   :  { %3364 = vpow2.f32 %v986_v7  ;;  %v985_v9 = vsub.f32 %v977_v60, %v983_v8 }
 0x970   :  { %v988_v10 = vmul.f32 1.442695, %v985_v9 }
 0x971   :  { %v1003_v12 = vpop.permute.xlu1 %1002 }
 0x972   :  { %3366 = vpow2.f32 %v988_v10  ;;  %v1008_v13 = vsel %vm340_vm3, %v1003_v12, 0 }
 0x973   :  { %3095 = vmatpush3.bf16.msra.mxu1 %v1008_v13 }
 0x974   :  { %3106 = vmatprep.subr.bf16.mxu1 %v3577_v0 }
 0x975   :  { %v3292_v35 = vpop.permute.xlu1 %3291 }
 0x976   :  { %v3294_v37 = vunpack.i.h.bf16 %v3292_v35  ;;  %v3293_v38 = vunpack.i.l.bf16 %v3292_v35 }
 0x978   :  { %v3365_v11 = vpop.eup %3364  ;;  %v1123_v42 = vsel %vm213_vm2, %v3819_v63, %v3294_v37  ;;  %v1122_v43 = vsel %vm213_vm2, %v3817_v59, %v3293_v38  ;;  %v2830_v63 = vld [vmem:[#allocation5] ss:$0 sm:$0xff] }
 0x979   :  { %v990_v48 = vsel %vm213_vm2, %v3365_v11, 0.0  ;;  %v3297_v36 = vpop.permute.xlu1 %3296 }
 0x97a   :  { %991 = vadd.xlane.f32.xlu0 %v990_v48  ;;  %v3299_v39 = vunpack.i.h.bf16 %v3297_v36  ;;  %v3298_v40 = vunpack.i.l.bf16 %v3297_v36  ;;  %v3326_v48 = vld [vmem:[%s4264_s9] sm:$0xff]  }
 0x97c   :  { %v3367_v52 = vpop.eup %3366  ;;  %v1126_v46 = vsel %vm1124_vm4, %v1123_v42, %v3299_v39  ;;  %v1125_v47 = vsel %vm1124_vm4, %v1122_v43, %v3298_v40  ;;  %v2840_v42 = vld [vmem:[%s4265_s10] ss:$0 sm:$0xff] }
 0x97d   :  { %v993_v53 = vsel %vm213_vm2, %v3367_v52, 0.0 }
 0x97e   :  { %994 = vadd.xlane.f32.xlu0 %v993_v53 }
 0x994   :  { %1050 = vrot.lane.b32.xlu0 %v3765_v14, %s3589_s21 }
 0xa07   :  { %v992_v15 = vpop.xlane.xlu0 %991 }
 0xa08   :  { %3368 = vrcp.f32 %v992_v15 }
 0xa0b   :  { %v995_v16 = vpop.xlane.xlu0 %994 }
 0xa0c   :  { %3370 = vrcp.f32 %v995_v16 }
 0xa0f   :  { %v1051_v17 = vpop.permute.xlu0 %1050 }
 0xa10   :  { %v1056_v18 = vsel %vm340_vm3, %v1051_v17, 0 }
 0xa11   :  { %3101 = vmatpush3.bf16.msra.mxu0 %v1056_v18 }
 0xa12   :  { %v3369_v19 = vpop.eup %3368  ;;  %3114 = vmatprep.subr.bf16.mxu0 %v3577_v0 }
 0xa13   :  { %v998_v20 = vmul.f32 %v3369_v19, %v3365_v11  ;;  %v3325_v11 = vld [vmem:[%s4262_s7 + $0x8] sm:$0xff]  }
 0xa15   :  { %v1000_v21 = vpack.c.bf16 %v998_v20, %v998_v20 }
 0xa16   :  { %v3371_v22 = vpop.eup %3370 }
 0xa17   :  { %v999_v23 = vmul.f32 %v3371_v22, %v3367_v52  ;;  %3097 = vmatmul.mubr.msk.bf16.vlgmr.msra.gmra.mrb[32].mxu1 %vm213_vm2, %v1000_v21  ;;  %v3327_v52 = vld [vmem:[%s4264_s9 + $0x8] sm:$0xff]   ;;  %v2834_v21 = vld [vmem:[#allocation7] ss:$0 sm:$0xff] }
 0xa18   :  { %3110 = vmatprep.mubr.msk.bf16.mxu1 %vm3578_vm0, %v3577_v0  ;;  %3107 = vmatpush3.bf16.msra.mxu1 %v3322_v24 }
 0xa19   :  { %v1001_v14 = vpack.c.bf16 %v999_v23, %v999_v23  ;;  %3108 = vmatprep.subr.bf16.mxu1 %v3577_v0 }
 0xa1b   :  { %3103 = vmatmul.mubr.msk.bf16.vlgmr.msra.gmra.mrb[28].mxu0 %vm213_vm2, %v1001_v14 }
 0xa1c   :  { %3118 = vmatprep.mubr.msk.bf16.mxu0 %vm3578_vm0, %v3577_v0  ;;  %3109 = vmatpush3.bf16.msra.mxu1 %v3323_v25  ;;  %v2835_v25 = vld [vmem:[#allocation8] ss:$0 sm:$0xff] }
 0xa1d   :  { %3122 = vmatprep.subr.bf16.mxu1 %v3577_v0 }
 0xaea   :  { %v1044_v26 = vpop.f32.mrb[32].mxu1 }
 0xaeb   :  { %v3098_v27 = vpop.f32.mrb[33].mxu1 }
 0xaec   :  { %v1047_v28 = vpop.f32.mrb[34].mxu1 }
 0xaed   :  { %v3099_v29 = vpop.f32.mrb[35].mxu1 }
 0xaee   :  { %v1092_v30 = vpop.f32.mrb[28].mxu0 }
 0xaef   :  { %v3300_v31 = vpack.i.bf16 %v1092_v30, %v1044_v26  ;;  %v3104_v32 = vpop.f32.mrb[29].mxu0  ;;  %v3328_v30 = vld [vmem:[%s4264_s9 + $0x10] sm:$0xff]  }
 0xaf0   :  { %v1095_v33 = vpop.f32.mrb[30].mxu0  ;;  %v2836_v32 = vld [vmem:[#allocation10] ss:$0 sm:$0xff] }
 0xaf1   :  { %v3105_v34 = vpop.f32.mrb[31].mxu0  ;;  %3301 = vrot.lane.b32.xlu0 %v3300_v31, %s3590_s8  ;;  %v3329_v31 = vld [vmem:[%s4264_s9 + $0x18] sm:$0xff]  }
 0xb63   :  { %v3302_v41 = vpop.permute.xlu0 %3301 }
 0xb64   :  { %v3304_v44 = vunpack.i.h.bf16 %v3302_v41  ;;  %v3303_v45 = vunpack.i.l.bf16 %v3302_v41 }
 0xb66   :  { %v1129_v49 = vsel %vm1127_vm5, %v1126_v46, %v3304_v44  ;;  %v1128_v50 = vsel %vm1127_vm5, %v1125_v47, %v3303_v45 }
 0xb67   :  { %v1130_v51 = vpack.c.bf16 %v1129_v49, %v1128_v50 }
 0xb69   :  { %3111 = vmatmul.mubr.msk.bf16.vlgmr.msra.gmra.mrb[36].mxu1 %vm163_vm1, %v1130_v51 }
 0xb6a   :  { %3130 = vmatprep.mubr.msk.bf16.mxu1 %vm3578_vm0, %v3577_v0  ;;  %3123 = vmatpush3.bf16.msra.mxu1 %v3326_v48 }
 0xb6b   :  { %3124 = vmatprep.subr.bf16.mxu1 %v3577_v0 }
 0xb6e   :  { %3125 = vmatpush3.bf16.msra.mxu1 %v3327_v52 }
 0xb6f   :  { %3126 = vmatprep.subr.bf16.mxu1 %v3577_v0 }
 0xb72   :  { %3127 = vmatpush3.bf16.msra.mxu1 %v3328_v30 }
 0xb73   :  { %3128 = vmatprep.subr.bf16.mxu1 %v3577_v0 }
 0xb76   :  { %3129 = vmatpush3.bf16.msra.mxu1 %v3329_v31 }
 0xb77   :  { %3148 = vmatprep.subr.bf16.mxu1 %v3577_v0 }
 0xc3c   :  { %v1186_v54 = vpop.f32.mrb[36].mxu1 }
 0xc3d   :  { %v1187_v55 = vadd.f32 %v2830_v63, %v1186_v54  ;;  %v3112_v59 = vpop.f32.mrb[37].mxu1 }
 0xc3e   :  { %v1189_v56 = vpop.f32.mrb[38].mxu1 }
 0xc3f   :  { %v1190_v57 = vadd.f32 %v2830_v63, %v1189_v56  ;;  %v3113_v58 = vpop.f32.mrb[39].mxu1  ;;  %v1193_v60 = vadd.f32 %v1187_v55, %v3747_v3 }
 0xc41   :  { %v1195_v61 = vsel %vm163_vm1, %v1193_v60, 0.0  ;;  %v1194_v62 = vadd.f32 %v1190_v57, %v3749_v4  ;;  %v3324_v4 = vld [vmem:[%s4262_s7] sm:$0xff]  }
 0xc42   :  { %1196 = vadd.xlane.f32.xlu1 %v1195_v61  ;;  %3115 = vmatpush3.bf16.msra.mxu0 %v3324_v4  ;;  %v2846_v4 = vld [vmem:[%s4266_s11] ss:$0 sm:$0xff] }
 0xc43   :  { %v1198_v1 = vsel %vm163_vm1, %v1194_v62, 0.0  ;;  %3116 = vmatprep.subr.bf16.mxu0 %v3577_v0 }
 0xc44   :  { %1199 = vadd.xlane.f32.xlu0 %v1198_v1 }
 0xc46   :  { %3117 = vmatpush3.bf16.msra.mxu0 %v3325_v11 }
 0xc47   :  { %3134 = vmatprep.subr.bf16.mxu0 %v3577_v0 }
 0xccf   :  { %v1197_v2 = vpop.xlane.xlu1 %1196 }
 0xcd0   :  { %v1202_v5 = vmul.f32 0.03125, %v1197_v2 }
 0xcd1   :  { %v1200_v6 = vpop.xlane.xlu0 %1199 }
 0xcd2   :  { %v1204_v7 = vsub.f32 %v1193_v60, %v1202_v5  ;;  %v1203_v8 = vmul.f32 0.03125, %v1200_v6  ;;  %v3330_v5 = vld [vmem:[%s4256_s1 + $0x10] sm:$0xff]   ;;  %v3331_v6 = vld [vmem:[%s4256_s1 + $0x18] sm:$0xff]  }
 0xcd4   :  { %v1205_v9 = vsub.f32 %v1194_v62, %v1203_v8  ;;  %v1206_v10 = vmul.f32 %v1204_v7, %v1204_v7 }
 0xcd6   :  { %v1208_v12 = vsel %vm163_vm1, %v1206_v10, 0.0  ;;  %v1207_v13 = vmul.f32 %v1205_v9, %v1205_v9 }
 0xcd7   :  { %1209 = vadd.xlane.f32.xlu0 %v1208_v12 }
 0xcd8   :  { %v1211_v3 = vsel %vm163_vm1, %v1207_v13, 0.0 }
 0xcd9   :  { %1212 = vadd.xlane.f32.xlu1 %v1211_v3 }
 0xd64   :  { %v1210_v53 = vpop.xlane.xlu0 %1209 }
 0xd65   :  { %v1214_v15 = vmul.f32 0.03125, %v1210_v53 }
 0xd66   :  { %v1213_v16 = vpop.xlane.xlu1 %1212 }
 0xd67   :  { %v1216_v17 = vadd.f32 1e-05, %v1214_v15  ;;  %v1215_v18 = vmul.f32 0.03125, %v1213_v16  ;;  %v2847_v15 = vld [vmem:[%s4267_s12] ss:$0 sm:$0xff] }
 0xd69   :  { %3372 = vrsqrt.f32 %v1216_v17  ;;  %v1217_v19 = vadd.f32 1e-05, %v1215_v18 }
 0xd6b   :  { %3374 = vrsqrt.f32 %v1217_v19 }
 0xd73   :  { %v3373_v20 = vpop.eup %3372 }
 0xd74   :  { %v1220_v22 = vmul.f32 %v3373_v20, %v1204_v7  ;;  %v2872_v20 = vld [vmem:[%s4257_s2 + $0x1] ss:$0 sm:$0xff] }
 0xd75   :  { %v3375_v23 = vpop.eup %3374 }
 0xd76   :  { %v1228_v14 = vmul.f32 %v2834_v21, %v1220_v22  ;;  %v1221_v24 = vmul.f32 %v3375_v23, %v1205_v9 }
 0xd78   :  { %v1229_v26 = vmul.f32 %v2834_v21, %v1221_v24  ;;  %v1236_v27 = vadd.f32 %v2835_v25, %v1228_v14 }
 0xd7a   :  { %v1237_v28 = vadd.f32 %v2835_v25, %v1229_v26 }
 0xd7c   :  { %v1238_v29 = vpack.c.bf16 %v1237_v28, %v1236_v27 }
 0xd7e   :  { %3119 = vmatmul.mubr.msk.bf16.vlgmr.msra.gmra.mrb[32].mxu0 %vm163_vm1, %v1238_v29 }
 0xd7f   :  { %3138 = vmatprep.mubr.msk.bf16.mxu0 %vm3578_vm0, %v3577_v0  ;;  %3135 = vmatpush3.bf16.msra.mxu0 %v3330_v5 }
 0xd80   :  { %3136 = vmatprep.subr.bf16.mxu0 %v3577_v0 }
 0xd83   :  { %3137 = vmatpush3.bf16.msra.mxu0 %v3331_v6 }
 0xd84   :  { %3142 = vmatprep.subr.bf16.mxu0 %v3577_v0 }
 0xe51   :  { %v1294_v33 = vpop.f32.mrb[32].mxu0 }
 0xe52   :  { %v1295_v34 = vadd.f32 %v2836_v32, %v1294_v33  ;;  %v3120_v35 = vpop.f32.mrb[33].mxu0 }
 0xe53   :  { %v1297_v36 = vpop.f32.mrb[34].mxu0 }
 0xe54   :  { %v1298_v37 = vadd.f32 %v2836_v32, %v1297_v36  ;;  %v3121_v38 = vpop.f32.mrb[35].mxu0  ;;  %v1301_v39 = vmax.f32 %v1295_v34, 0.0 }
 0xe56   :  { %v1302_v40 = vmax.f32 %v1298_v37, 0.0 }
 0xe58   :  { %v1303_v41 = vpack.c.bf16 %v1302_v40, %v1301_v39 }
 0xe5a   :  { %3131 = vmatmul.mubr.msk.bf16.vlgmr.msra.gmra.mrb[40].mxu1 %vm1334_vm6, %v1303_v41 }
 0xe5b   :  { %3150 = vmatprep.mubr.msk.bf16.mxu1 %vm3578_vm0, %v3577_v0 }
 0xf2d   :  { %v1372_v43 = vpop.f32.mrb[40].mxu1 }
 0xf2e   :  { %v1373_v44 = vadd.f32 %v2840_v42, %v1372_v43  ;;  %v3132_v45 = vpop.f32.mrb[41].mxu1 }
 0xf2f   :  { %v1375_v46 = vpop.f32.mrb[42].mxu1 }
 0xf30   :  { %v1376_v47 = vadd.f32 %v2840_v42, %v1375_v46  ;;  %v3133_v49 = vpop.f32.mrb[43].mxu1  ;;  %v1379_v50 = vadd.f32 %v1373_v44, %v1236_v27 }
 0xf32   :  { %v1381_v51 = vsel %vm163_vm1, %v1379_v50, 0.0  ;;  %v1380_v63 = vadd.f32 %v1376_v47, %v1237_v28 }
 0xf33   :  { %1382 = vadd.xlane.f32.xlu0 %v1381_v51 }
 0xf34   :  { %v1384_v54 = vsel %vm163_vm1, %v1380_v63, 0.0 }
 0xf35   :  { %1385 = vadd.xlane.f32.xlu1 %v1384_v54 }
 0xfc0   :  { %v1383_v55 = vpop.xlane.xlu0 %1382 }
 0xfc1   :  { %v1387_v59 = vmul.f32 0.03125, %v1383_v55 }
 0xfc2   :  { %v1386_v56 = vpop.xlane.xlu1 %1385 }
 0xfc3   :  { %v1389_v57 = vsub.f32 %v1379_v50, %v1387_v59  ;;  %v1388_v58 = vmul.f32 0.03125, %v1386_v56 }
 0xfc5   :  { %v1390_v60 = vsub.f32 %v1380_v63, %v1388_v58  ;;  %v1391_v61 = vmul.f32 %v1389_v57, %v1389_v57 }
 0xfc7   :  { %v1393_v62 = vsel %vm163_vm1, %v1391_v61, 0.0  ;;  %v1392_v1 = vmul.f32 %v1390_v60, %v1390_v60 }
 0xfc8   :  { %1394 = vadd.xlane.f32.xlu0 %v1393_v62 }
 0xfc9   :  { %v1396_v2 = vsel %vm163_vm1, %v1392_v1, 0.0 }
 0xfca   :  { %1397 = vadd.xlane.f32.xlu1 %v1396_v2 }
0x1055   :  { %v1395_v7 = vpop.xlane.xlu0 %1394 }
0x1056   :  { %v1399_v8 = vmul.f32 0.03125, %v1395_v7 }
0x1057   :  { %v1398_v9 = vpop.xlane.xlu1 %1397 }
0x1058   :  { %v1401_v10 = vadd.f32 1e-05, %v1399_v8  ;;  %v1400_v12 = vmul.f32 0.03125, %v1398_v9 }
0x105a   :  { %3376 = vrsqrt.f32 %v1401_v10  ;;  %v1402_v13 = vadd.f32 1e-05, %v1400_v12 }
0x105c   :  { %3378 = vrsqrt.f32 %v1402_v13 }
0x1064   :  { %v3377_v3 = vpop.eup %3376 }
0x1065   :  { %v1405_v11 = vmul.f32 %v3377_v3, %v1389_v57 }
0x1066   :  { %v3379_v48 = vpop.eup %3378 }
0x1067   :  { %v1413_v52 = vmul.f32 %v2846_v4, %v1405_v11  ;;  %v1406_v53 = vmul.f32 %v3379_v48, %v1390_v60 }
0x1069   :  { %v1414_v16 = vmul.f32 %v2846_v4, %v1406_v53  ;;  %v3999_v17 = vadd.f32 %v2847_v15, %v1413_v52 }
0x106b   :  { %v4001_v18 = vadd.f32 %v2847_v15, %v1414_v16 }
0x106d   :  { %v1463_v19 = vpack.c.bf16 %v4001_v18, %v3999_v17 }
0x106f   :  { %3139 = vmatmul.mubr.msk.bf16.vlgmr.msra.gmra.mrb[36].mxu0 %vm163_vm1, %v1463_v19 }
0x1070   :  { %3144 = vmatprep.mubr.msk.bf16.mxu0 %vm3578_vm0, %v3577_v0 }
0x1142   :  { %v1519_v21 = vpop.f32.mrb[36].mxu0 }
0x1143   :  { %v1520_v22 = vadd.f32 %v2872_v20, %v1519_v21  ;;  %v3140_v23 = vpop.f32.mrb[37].mxu0 }
0x1144   :  { %v1522_v14 = vpop.f32.mrb[38].mxu0 }
0x1145   :  { %v4011_v24 = vpack.c.bf16 %v1520_v22, %v1520_v22  ;;  %v1523_v25 = vadd.f32 %v2872_v20, %v1522_v14  ;;  %v3141_v26 = vpop.f32.mrb[39].mxu0 }
0x1147   :  { %v4013_v27 = vpack.c.bf16 %v1523_v25, %v1523_v25  ;;  %1529 = vrot.lane.b32.xlu0 %v4011_v24, %s3579_s29 }
0x1149   :  { %1578 = vrot.lane.b32.xlu1 %v4013_v27, %s3579_s29 }
0x11b9   :  { %v1530_v28 = vpop.permute.xlu0 %1529 }
0x11ba   :  { %v1535_v29 = vsel %vm213_vm2, %v1530_v28, 0 }
0x11bb   :  { %3143 = vmatpush3.bf16.xpose.msra.mxu0 %v1535_v29  ;;  %v1579_v30 = vpop.permute.xlu1 %1578 }
0x11bc   :  { %v1584_v31 = vsel %vm213_vm2, %v1579_v30, 0  ;;  %3154 = vmatprep.subr.bf16.mxu0 %v3577_v0 }
0x11bd   :  { %3149 = vmatpush3.bf16.xpose.msra.mxu1 %v1584_v31 }
0x11be   :  { %3160 = vmatprep.subr.bf16.mxu1 %v3577_v0 }
0x11c2   :  { %3145 = vmatmul.mubr.msk.bf16.vlgmr.msra.gmra.mrb[40].mxu0 %vm213_vm2, %v4011_v24 }
0x11c3   :  { %3156 = vmatprep.mubr.msk.bf16.mxu0 %vm3578_vm0, %v3577_v0 }
0x11c4   :  { %3151 = vmatmul.mubr.msk.bf16.vlgmr.msra.gmra.mrb[44].mxu1 %vm213_vm2, %v4013_v27 }
0x11c5   :  { %3162 = vmatprep.mubr.msk.bf16.mxu1 %vm3578_vm0, %v3577_v0 }
0x1295   :  { %v1571_v32 = vpop.f32.mrb[40].mxu0 }
0x1296   :  { %v1626_v33 = vmul.f32 0.35355338, %v1571_v32  ;;  %v3146_v34 = vpop.f32.mrb[41].mxu0 }
0x1297   :  { %v1574_v35 = vpop.f32.mrb[42].mxu0  ;;  %v1620_v36 = vpop.f32.mrb[44].mxu1 }
0x1298   :  { %v1627_v37 = vmul.f32 0.35355338, %v1620_v36  ;;  %v3147_v38 = vpop.f32.mrb[43].mxu0  ;;  %v3152_v39 = vpop.f32.mrb[45].mxu1  ;;  %v1628_v40 = vsel %vm213_vm2, %v1626_v33, -inf }
0x1299   :  { %1629 = vmax.xlane.f32.xlu1 %v1628_v40  ;;  %v1623_v41 = vpop.f32.mrb[46].mxu1 }
0x129a   :  { %v3153_v42 = vpop.f32.mrb[47].mxu1  ;;  %v1631_v43 = vsel %vm213_vm2, %v1627_v37, -inf }
0x129b   :  { %1632 = vmax.xlane.f32.xlu0 %v1631_v43 }
0x12aa   :  { %1700 = vrot.lane.b32.xlu1 %v4013_v27, %s3580_s0 }
0x12b1   :  { %1652 = vrot.lane.b32.xlu0 %v4011_v24, %s3580_s0 }
0x1326   :  { %v1630_v44 = vpop.xlane.xlu1 %1629 }
0x1327   :  { %v1634_v45 = vsub.f32 %v1626_v33, %v1630_v44 }
0x1328   :  { %v1633_v46 = vpop.xlane.xlu0 %1632 }
0x1329   :  { %v1636_v47 = vmul.f32 1.442695, %v1634_v45  ;;  %v1635_v49 = vsub.f32 %v1627_v37, %v1633_v46 }
0x132a   :  { %v1701_v50 = vpop.permute.xlu1 %1700 }
0x132b   :  { %3380 = vpow2.f32 %v1636_v47  ;;  %v1638_v51 = vmul.f32 1.442695, %v1635_v49  ;;  %v1706_v63 = vsel %vm340_vm3, %v1701_v50, 0 }
0x132c   :  { %3161 = vmatpush3.bf16.msra.mxu1 %v1706_v63  ;;  %v1653_v54 = vpop.permute.xlu0 %1652 }
0x132d   :  { %3382 = vpow2.f32 %v1638_v51  ;;  %v1658_v55 = vsel %vm340_vm3, %v1653_v54, 0  ;;  %3172 = vmatprep.subr.bf16.mxu1 %v3577_v0 }
0x132e   :  { %3155 = vmatpush3.bf16.msra.mxu0 %v1658_v55 }
0x132f   :  { %3166 = vmatprep.subr.bf16.mxu0 %v3577_v0 }
0x1335   :  { %v3381_v59 = vpop.eup %3380 }
0x1336   :  { %v1640_v56 = vsel %vm213_vm2, %v3381_v59, 0.0 }
0x1337   :  { %v3383_v57 = vpop.eup %3382  ;;  %1641 = vadd.xlane.f32.xlu0 %v1640_v56 }
0x1338   :  { %v1643_v58 = vsel %vm213_vm2, %v3383_v57, 0.0 }
0x1339   :  { %1644 = vadd.xlane.f32.xlu1 %v1643_v58 }
0x134a   :  { %1750 = vrot.lane.b32.xlu1 %v4011_v24, %s3581_s25 }
0x134d   :  { %1800 = vrot.lane.b32.xlu0 %v4013_v27, %s3581_s25 }
0x134e   :  { %1748 = vrot.lane.b32.xlu1 %v4011_v24, %s3582_s30 }
0x1351   :  { %1798 = vrot.lane.b32.xlu0 %v4013_v27, %s3582_s30 }
0x13c4   :  { %v1642_v60 = vpop.xlane.xlu0 %1641 }
0x13c5   :  { %3384 = vrcp.f32 %v1642_v60 }
0x13c6   :  { %v1645_v61 = vpop.xlane.xlu1 %1644 }
0x13c7   :  { %3386 = vrcp.f32 %v1645_v61 }
0x13c8   :  { %v1801_v8 = vpop.permute.xlu0 %1800 }
0x13c9   :  { %v1806_v12 = vsel %vm213_vm2, %v1801_v8, 0 }
0x13ca   :  { %v1751_v5 = vpop.permute.xlu1 %1750 }
0x13cb   :  { %v1756_v9 = vsel %vm213_vm2, %v1751_v5, 0 }
0x13cc   :  { %v1799_v3 = vpop.permute.xlu0 %1798 }
0x13ce   :  { %v1749_v13 = vpop.permute.xlu1 %1748 }
0x13cf   :  { %v3385_v62 = vpop.eup %3384 }
0x13d0   :  { %v1648_v1 = vmul.f32 %v3385_v62, %v3381_v59 }
0x13d1   :  { %v3387_v2 = vpop.eup %3386 }
0x13d2   :  { %v1649_v6 = vmul.f32 %v3387_v2, %v3383_v57  ;;  %v1650_v7 = vpack.c.bf16 %v1648_v1, %v1648_v1 }
0x13d4   :  { %3157 = vmatmul.mubr.msk.bf16.vlgmr.msra.gmra.mrb[44].mxu0 %vm213_vm2, %v1650_v7  ;;  %v1651_v10 = vpack.c.bf16 %v1649_v6, %v1649_v6 }
0x13d5   :  { %3167 = vmatpush3.bf16.xpose.msra.mxu0 %v1756_v9  ;;  %3168 = vmatprep.mubr.msk.bf16.mxu0 %vm3578_vm0, %v3577_v0 }
0x13d6   :  { %3163 = vmatmul.mubr.msk.bf16.vlgmr.msra.gmra.mrb[48].mxu1 %vm213_vm2, %v1651_v10  ;;  %3178 = vmatprep.subr.bf16.mxu0 %v3577_v0 }
0x13d7   :  { %3173 = vmatpush3.bf16.xpose.msra.mxu1 %v1806_v12  ;;  %3174 = vmatprep.mubr.msk.bf16.mxu1 %vm3578_vm0, %v3577_v0 }
0x13d8   :  { %3184 = vmatprep.subr.bf16.mxu1 %v3577_v0 }
0x13dc   :  { %3169 = vmatmul.mubr.msk.bf16.vlgmr.msra.gmra.mrb[48].mxu0 %vm213_vm2, %v1749_v13 }
0x13dd   :  { %3180 = vmatprep.mubr.msk.bf16.mxu0 %vm3578_vm0, %v3577_v0 }
0x13de   :  { %3175 = vmatmul.mubr.msk.bf16.vlgmr.msra.gmra.mrb[52].mxu1 %vm213_vm2, %v1799_v3 }
0x13df   :  { %3186 = vmatprep.mubr.msk.bf16.mxu1 %vm3578_vm0, %v3577_v0 }
0x14a7   :  { %v4067_v4 = vpop.f32.mrb[44].mxu0 }
0x14a8   :  { %v3158_v11 = vpop.f32.mrb[45].mxu0 }
0x14a9   :  { %v1697_v48 = vpop.f32.mrb[46].mxu0  ;;  %v4069_v52 = vpop.f32.mrb[48].mxu1 }
0x14aa   :  { %v3159_v53 = vpop.f32.mrb[47].mxu0  ;;  %v3164_v15 = vpop.f32.mrb[49].mxu1 }
0x14ab   :  { %v1745_v16 = vpop.f32.mrb[50].mxu1 }
0x14ac   :  { %v3165_v19 = vpop.f32.mrb[51].mxu1 }
0x14af   :  { %v1792_v20 = vpop.f32.mrb[48].mxu0 }
0x14b0   :  { %v1848_v21 = vmul.f32 0.35355338, %v1792_v20  ;;  %v3170_v22 = vpop.f32.mrb[49].mxu0 }
0x14b1   :  { %v1795_v23 = vpop.f32.mrb[50].mxu0  ;;  %v1842_v14 = vpop.f32.mrb[52].mxu1 }
0x14b2   :  { %v1849_v25 = vmul.f32 0.35355338, %v1842_v14  ;;  %v3171_v26 = vpop.f32.mrb[51].mxu0  ;;  %v3176_v28 = vpop.f32.mrb[53].mxu1  ;;  %v1850_v29 = vsel %vm213_vm2, %v1848_v21, -inf }
0x14b3   :  { %1851 = vmax.xlane.f32.xlu1 %v1850_v29  ;;  %v1845_v30 = vpop.f32.mrb[54].mxu1 }
0x14b4   :  { %v3177_v31 = vpop.f32.mrb[55].mxu1  ;;  %v1853_v32 = vsel %vm213_vm2, %v1849_v25, -inf }
0x14b5   :  { %1854 = vmax.xlane.f32.xlu0 %v1853_v32 }
0x14c4   :  { %1922 = vrot.lane.b32.xlu1 %v4013_v27, %s3583_s6 }
0x14cb   :  { %1874 = vrot.lane.b32.xlu0 %v4011_v24, %s3583_s6 }
0x1540   :  { %v1852_v33 = vpop.xlane.xlu1 %1851 }
0x1541   :  { %v1856_v34 = vsub.f32 %v1848_v21, %v1852_v33 }
0x1542   :  { %v1855_v35 = vpop.xlane.xlu0 %1854 }
0x1543   :  { %v1858_v36 = vmul.f32 1.442695, %v1856_v34  ;;  %v1857_v37 = vsub.f32 %v1849_v25, %v1855_v35 }
0x1544   :  { %v1923_v38 = vpop.permute.xlu1 %1922 }
0x1545   :  { %3388 = vpow2.f32 %v1858_v36  ;;  %v1860_v39 = vmul.f32 1.442695, %v1857_v37  ;;  %v1928_v40 = vsel %vm340_vm3, %v1923_v38, 0 }
0x1546   :  { %3185 = vmatpush3.bf16.msra.mxu1 %v1928_v40  ;;  %v1875_v41 = vpop.permute.xlu0 %1874 }
0x1547   :  { %3390 = vpow2.f32 %v1860_v39  ;;  %v1880_v42 = vsel %vm340_vm3, %v1875_v41, 0  ;;  %3196 = vmatprep.subr.bf16.mxu1 %v3577_v0 }
0x1548   :  { %3179 = vmatpush3.bf16.msra.mxu0 %v1880_v42 }
0x1549   :  { %3190 = vmatprep.subr.bf16.mxu0 %v3577_v0 }
0x154f   :  { %v3389_v43 = vpop.eup %3388 }
0x1550   :  { %v1862_v44 = vsel %vm213_vm2, %v3389_v43, 0.0 }
0x1551   :  { %v3391_v45 = vpop.eup %3390  ;;  %1863 = vadd.xlane.f32.xlu0 %v1862_v44 }
0x1552   :  { %v1865_v46 = vsel %vm213_vm2, %v3391_v45, 0.0 }
0x1553   :  { %1866 = vadd.xlane.f32.xlu1 %v1865_v46 }
0x1564   :  { %1972 = vrot.lane.b32.xlu1 %v4011_v24, %s3584_s14 }
0x1567   :  { %2022 = vrot.lane.b32.xlu0 %v4013_v27, %s3584_s14 }
0x1568   :  { %1970 = vrot.lane.b32.xlu1 %v4011_v24, %s3585_s15 }
0x156b   :  { %2020 = vrot.lane.b32.xlu0 %v4013_v27, %s3585_s15 }
0x15de   :  { %v1864_v47 = vpop.xlane.xlu0 %1863 }
0x15df   :  { %3392 = vrcp.f32 %v1864_v47 }
0x15e0   :  { %v1867_v49 = vpop.xlane.xlu1 %1866 }
0x15e1   :  { %3394 = vrcp.f32 %v1867_v49 }
0x15e2   :  { %v2023_v56 = vpop.permute.xlu0 %2022 }
0x15e3   :  { %v2028_v60 = vsel %vm213_vm2, %v2023_v56, 0 }
0x15e4   :  { %v1973_v54 = vpop.permute.xlu1 %1972 }
0x15e5   :  { %v1978_v57 = vsel %vm213_vm2, %v1973_v54, 0 }
0x15e6   :  { %v2021_v62 = vpop.permute.xlu0 %2020 }
0x15e8   :  { %v1971_v61 = vpop.permute.xlu1 %1970 }
0x15e9   :  { %v3393_v50 = vpop.eup %3392 }
0x15ea   :  { %v1870_v51 = vmul.f32 %v3393_v50, %v3389_v43 }
0x15eb   :  { %v3395_v63 = vpop.eup %3394 }
0x15ec   :  { %v1871_v55 = vmul.f32 %v3395_v63, %v3391_v45  ;;  %v1872_v59 = vpack.c.bf16 %v1870_v51, %v1870_v51 }
0x15ee   :  { %3181 = vmatmul.mubr.msk.bf16.vlgmr.msra.gmra.mrb[52].mxu0 %vm213_vm2, %v1872_v59  ;;  %v1873_v58 = vpack.c.bf16 %v1871_v55, %v1871_v55 }
0x15ef   :  { %3191 = vmatpush3.bf16.xpose.msra.mxu0 %v1978_v57  ;;  %3192 = vmatprep.mubr.msk.bf16.mxu0 %vm3578_vm0, %v3577_v0 }
0x15f0   :  { %3187 = vmatmul.mubr.msk.bf16.vlgmr.msra.gmra.mrb[56].mxu1 %vm213_vm2, %v1873_v58  ;;  %3202 = vmatprep.subr.bf16.mxu0 %v3577_v0 }
0x15f1   :  { %3197 = vmatpush3.bf16.xpose.msra.mxu1 %v2028_v60  ;;  %3198 = vmatprep.mubr.msk.bf16.mxu1 %vm3578_vm0, %v3577_v0 }
0x15f2   :  { %3208 = vmatprep.subr.bf16.mxu1 %v3577_v0 }
0x15f6   :  { %3193 = vmatmul.mubr.msk.bf16.vlgmr.msra.gmra.mrb[56].mxu0 %vm213_vm2, %v1971_v61 }
0x15f7   :  { %3204 = vmatprep.mubr.msk.bf16.mxu0 %vm3578_vm0, %v3577_v0 }
0x15f8   :  { %3199 = vmatmul.mubr.msk.bf16.vlgmr.msra.gmra.mrb[60].mxu1 %vm213_vm2, %v2021_v62 }
0x15f9   :  { %3210 = vmatprep.mubr.msk.bf16.mxu1 %vm3578_vm0, %v3577_v0 }
0x16c1   :  { %v4107_v1 = vpop.f32.mrb[52].mxu0 }
0x16c2   :  { %v3182_v2 = vpop.f32.mrb[53].mxu0 }
0x16c3   :  { %v1919_v5 = vpop.f32.mrb[54].mxu0  ;;  %v4109_v6 = vpop.f32.mrb[56].mxu1 }
0x16c4   :  { %v3305_v7 = vpack.i.bf16 %v4109_v6, %v4107_v1  ;;  %v3183_v8 = vpop.f32.mrb[55].mxu0  ;;  %v3188_v9 = vpop.f32.mrb[57].mxu1 }
0x16c5   :  { %v1967_v10 = vpop.f32.mrb[58].mxu1 }
0x16c6   :  { %v3189_v12 = vpop.f32.mrb[59].mxu1 }
0x16c9   :  { %v2014_v13 = vpop.f32.mrb[56].mxu0 }
0x16ca   :  { %v2070_v3 = vmul.f32 0.35355338, %v2014_v13  ;;  %v3194_v11 = vpop.f32.mrb[57].mxu0 }
0x16cb   :  { %v2017_v48 = vpop.f32.mrb[58].mxu0  ;;  %v2064_v53 = vpop.f32.mrb[60].mxu1 }
0x16cc   :  { %v2071_v15 = vmul.f32 0.35355338, %v2064_v53  ;;  %v3195_v16 = vpop.f32.mrb[59].mxu0  ;;  %v3200_v19 = vpop.f32.mrb[61].mxu1  ;;  %v2072_v20 = vsel %vm213_vm2, %v2070_v3, -inf }
0x16cd   :  { %2073 = vmax.xlane.f32.xlu1 %v2072_v20  ;;  %v2067_v21 = vpop.f32.mrb[62].mxu1 }
0x16ce   :  { %v3201_v22 = vpop.f32.mrb[63].mxu1  ;;  %v2075_v23 = vsel %vm213_vm2, %v2071_v15, -inf }
0x16cf   :  { %2076 = vmax.xlane.f32.xlu0 %v2075_v23 }
0x16de   :  { %2144 = vrot.lane.b32.xlu1 %v4013_v27, %s3586_s16 }
0x16e5   :  { %2096 = vrot.lane.b32.xlu0 %v4011_v24, %s3586_s16 }
0x175a   :  { %v2074_v14 = vpop.xlane.xlu1 %2073 }
0x175b   :  { %v2078_v25 = vsub.f32 %v2070_v3, %v2074_v14 }
0x175c   :  { %v2077_v26 = vpop.xlane.xlu0 %2076 }
0x175d   :  { %v2080_v28 = vmul.f32 1.442695, %v2078_v25  ;;  %v2079_v29 = vsub.f32 %v2071_v15, %v2077_v26 }
0x175e   :  { %v2145_v30 = vpop.permute.xlu1 %2144 }
0x175f   :  { %3396 = vpow2.f32 %v2080_v28  ;;  %v2082_v31 = vmul.f32 1.442695, %v2079_v29  ;;  %v2150_v32 = vsel %vm340_vm3, %v2145_v30, 0 }
0x1760   :  { %3209 = vmatpush3.bf16.msra.mxu1 %v2150_v32  ;;  %v2097_v33 = vpop.permute.xlu0 %2096 }
0x1761   :  { %3398 = vpow2.f32 %v2082_v31  ;;  %v2102_v34 = vsel %vm340_vm3, %v2097_v33, 0  ;;  %3220 = vmatprep.subr.bf16.mxu1 %v3577_v0 }
0x1762   :  { %3203 = vmatpush3.bf16.msra.mxu0 %v2102_v34 }
0x1763   :  { %3214 = vmatprep.subr.bf16.mxu0 %v3577_v0 }
0x1769   :  { %v3397_v35 = vpop.eup %3396 }
0x176a   :  { %v2084_v36 = vsel %vm213_vm2, %v3397_v35, 0.0 }
0x176b   :  { %v3399_v37 = vpop.eup %3398  ;;  %2085 = vadd.xlane.f32.xlu0 %v2084_v36 }
0x176c   :  { %v2087_v38 = vsel %vm213_vm2, %v3399_v37, 0.0 }
0x176d   :  { %2088 = vadd.xlane.f32.xlu1 %v2087_v38  ;;  %v3333_v38 = vld [vmem:[%s4258_s3 + $0x18] sm:$0xff]  }
0x177e   :  { %2194 = vrot.lane.b32.xlu1 %v4011_v24, %s3587_s26 }
0x1781   :  { %2244 = vrot.lane.b32.xlu0 %v4013_v27, %s3587_s26 }
0x1782   :  { %2192 = vrot.lane.b32.xlu1 %v4011_v24, %s3588_s20 }
0x1785   :  { %2242 = vrot.lane.b32.xlu0 %v4013_v27, %s3588_s20 }
0x17f8   :  { %v2086_v39 = vpop.xlane.xlu0 %2085 }
0x17f9   :  { %3400 = vrcp.f32 %v2086_v39 }
0x17fa   :  { %v2089_v40 = vpop.xlane.xlu1 %2088 }
0x17fb   :  { %3402 = vrcp.f32 %v2089_v40 }
0x17fc   :  { %v2245_v47 = vpop.permute.xlu0 %2244 }
0x17fd   :  { %v2250_v51 = vsel %vm213_vm2, %v2245_v47, 0 }
0x17fe   :  { %v2195_v44 = vpop.permute.xlu1 %2194 }
0x17ff   :  { %v2200_v49 = vsel %vm213_vm2, %v2195_v44, 0 }
0x1800   :  { %v2243_v54 = vpop.permute.xlu0 %2242 }
0x1802   :  { %v2193_v63 = vpop.permute.xlu1 %2192 }
0x1803   :  { %v3401_v41 = vpop.eup %3400 }
0x1804   :  { %v2092_v42 = vmul.f32 %v3401_v41, %v3397_v35 }
0x1805   :  { %v3403_v43 = vpop.eup %3402 }
0x1806   :  { %v2093_v45 = vmul.f32 %v3403_v43, %v3399_v37  ;;  %v2094_v46 = vpack.c.bf16 %v2092_v42, %v2092_v42  ;;  %v3332_v37 = vld [vmem:[%s4258_s3 + $0x10] sm:$0xff]  }
0x1808   :  { %3205 = vmatmul.mubr.msk.bf16.vlgmr.msra.gmra.mrb[60].mxu0 %vm213_vm2, %v2094_v46  ;;  %v2095_v50 = vpack.c.bf16 %v2093_v45, %v2093_v45 }
0x1809   :  { %3215 = vmatpush3.bf16.xpose.msra.mxu0 %v2200_v49  ;;  %3216 = vmatprep.mubr.msk.bf16.mxu0 %vm3578_vm0, %v3577_v0 }
0x180a   :  { %3211 = vmatmul.mubr.msk.bf16.vlgmr.msra.gmra.mrb[64].mxu1 %vm213_vm2, %v2095_v50  ;;  %3226 = vmatprep.subr.bf16.mxu0 %v3577_v0 }
0x180b   :  { %3221 = vmatpush3.bf16.xpose.msra.mxu1 %v2250_v51  ;;  %3222 = vmatprep.mubr.msk.bf16.mxu1 %vm3578_vm0, %v3577_v0 }
0x180c   :  { %3232 = vmatprep.subr.bf16.mxu1 %v3577_v0 }
0x1810   :  { %3217 = vmatmul.mubr.msk.bf16.vlgmr.msra.gmra.mrb[64].mxu0 %vm213_vm2, %v2193_v63 }
0x1811   :  { %3228 = vmatprep.mubr.msk.bf16.mxu0 %vm3578_vm0, %v3577_v0 }
0x1812   :  { %3223 = vmatmul.mubr.msk.bf16.vlgmr.msra.gmra.mrb[68].mxu1 %vm213_vm2, %v2243_v54 }
0x1813   :  { %3234 = vmatprep.mubr.msk.bf16.mxu1 %vm3578_vm0, %v3577_v0 }
0x18db   :  { %v2138_v55 = vpop.f32.mrb[60].mxu0 }
0x18dc   :  { %v3206_v59 = vpop.f32.mrb[61].mxu0 }
0x18dd   :  { %v2141_v56 = vpop.f32.mrb[62].mxu0  ;;  %v2186_v57 = vpop.f32.mrb[64].mxu1 }
0x18de   :  { %v3310_v58 = vpack.i.bf16 %v2186_v57, %v2138_v55  ;;  %v3207_v60 = vpop.f32.mrb[63].mxu0  ;;  %v3212_v61 = vpop.f32.mrb[65].mxu1 }
0x18df   :  { %v2189_v62 = vpop.f32.mrb[66].mxu1 }
0x18e0   :  { %v3213_v2 = vpop.f32.mrb[67].mxu1 }
0x18e3   :  { %v2236_v5 = vpop.f32.mrb[64].mxu0 }
0x18e4   :  { %v2292_v8 = vmul.f32 0.35355338, %v2236_v5  ;;  %v3218_v9 = vpop.f32.mrb[65].mxu0 }
0x18e5   :  { %v2239_v10 = vpop.f32.mrb[66].mxu0  ;;  %v2286_v12 = vpop.f32.mrb[68].mxu1 }
0x18e6   :  { %v2293_v13 = vmul.f32 0.35355338, %v2286_v12  ;;  %v3219_v3 = vpop.f32.mrb[67].mxu0  ;;  %v3224_v11 = vpop.f32.mrb[69].mxu1  ;;  %v2294_v48 = vsel %vm213_vm2, %v2292_v8, -inf }
0x18e7   :  { %2295 = vmax.xlane.f32.xlu1 %v2294_v48  ;;  %v2289_v53 = vpop.f32.mrb[70].mxu1 }
0x18e8   :  { %v3225_v15 = vpop.f32.mrb[71].mxu1  ;;  %v2297_v16 = vsel %vm213_vm2, %v2293_v13, -inf }
0x18e9   :  { %2298 = vmax.xlane.f32.xlu0 %v2297_v16 }
0x1974   :  { %v2296_v19 = vpop.xlane.xlu1 %2295 }
0x1975   :  { %v2300_v20 = vsub.f32 %v2292_v8, %v2296_v19 }
0x1976   :  { %v2299_v21 = vpop.xlane.xlu0 %2298 }
0x1977   :  { %v2302_v22 = vmul.f32 1.442695, %v2300_v20  ;;  %v2301_v23 = vsub.f32 %v2293_v13, %v2299_v21 }
0x1979   :  { %3404 = vpow2.f32 %v2302_v22  ;;  %v2304_v14 = vmul.f32 1.442695, %v2301_v23 }
0x197b   :  { %3406 = vpow2.f32 %v2304_v14 }
0x1983   :  { %v3405_v25 = vpop.eup %3404 }
0x1984   :  { %v2306_v26 = vsel %vm213_vm2, %v3405_v25, 0.0 }
0x1985   :  { %v3407_v28 = vpop.eup %3406  ;;  %2307 = vadd.xlane.f32.xlu0 %v2306_v26 }
0x1986   :  { %v2309_v29 = vsel %vm213_vm2, %v3407_v28, 0.0 }
0x1987   :  { %2310 = vadd.xlane.f32.xlu1 %v2309_v29  ;;  %v3336_v29 = vld [vmem:[%s4264_s9 + $0x20] sm:$0xff]  }
0x1998   :  { %2366 = vrot.lane.b32.xlu1 %v4013_v27, %s3589_s21 }
0x199b   :  { %2318 = vrot.lane.b32.xlu0 %v4011_v24, %s3589_s21 }
0x199c   :  { %3306 = vrot.lane.b32.xlu1 %v3305_v7, %s3574_s23 }
0x199f   :  { %3311 = vrot.lane.b32.xlu0 %v3310_v58, %s3569_s18 }
0x1a12   :  { %v2308_v30 = vpop.xlane.xlu0 %2307 }
0x1a13   :  { %3408 = vrcp.f32 %v2308_v30  ;;  %v3337_v30 = vld [vmem:[%s4264_s9 + $0x28] sm:$0xff]  }
0x1a14   :  { %v2311_v31 = vpop.xlane.xlu1 %2310 }
0x1a15   :  { %3410 = vrcp.f32 %v2311_v31 }
0x1a16   :  { %v2319_v32 = vpop.permute.xlu0 %2318 }
0x1a17   :  { %v2324_v33 = vsel %vm340_vm3, %v2319_v32, 0 }
0x1a18   :  { %v2367_v34 = vpop.permute.xlu1 %2366  ;;  %3227 = vmatpush3.bf16.msra.mxu0 %v2324_v33 }
0x1a19   :  { %v2372_v27 = vsel %vm340_vm3, %v2367_v34, 0  ;;  %3238 = vmatprep.subr.bf16.mxu0 %v3577_v0 }
0x1a1a   :  { %3233 = vmatpush3.bf16.msra.mxu1 %v2372_v27  ;;  %v3312_v63 = vpop.permute.xlu0 %3311 }
0x1a1b   :  { %3246 = vmatprep.subr.bf16.mxu1 %v3577_v0  ;;  %v3314_v59 = vunpack.i.h.bf16 %v3312_v63  ;;  %v3313_v56 = vunpack.i.l.bf16 %v3312_v63 }
0x1a1c   :  { %v3307_v49 = vpop.permute.xlu1 %3306 }
0x1a1d   :  { %v3409_v24 = vpop.eup %3408  ;;  %v3309_v50 = vunpack.i.h.bf16 %v3307_v49  ;;  %v3308_v51 = vunpack.i.l.bf16 %v3307_v49 }
0x1a1e   :  { %v2314_v1 = vmul.f32 %v3409_v24, %v3405_v25 }
0x1a1f   :  { %v3411_v6 = vpop.eup %3410  ;;  %v2439_v54 = vsel %vm213_vm2, %v4069_v52, %v3309_v50  ;;  %v2438_v55 = vsel %vm213_vm2, %v4067_v4, %v3308_v51  ;;  %v2892_v4 = vld [vmem:[#allocation5 + $0x1] ss:$0 sm:$0xff] }
0x1a20   :  { %v2315_v7 = vmul.f32 %v3411_v6, %v3407_v28  ;;  %v2316_v35 = vpack.c.bf16 %v2314_v1, %v2314_v1  ;;  %v2440_v61 = vsel %vm1124_vm4, %v2438_v55, %v3313_v56  ;;  %v2441_v62 = vsel %vm1124_vm4, %v2439_v54, %v3314_v59  ;;  %v3335_v28 = vld [vmem:[%s4262_s7 + $0x18] sm:$0xff]  }
0x1a22   :  { %3229 = vmatmul.mubr.msk.bf16.vlgmr.msra.gmra.mrb[68].mxu0 %vm213_vm2, %v2316_v35  ;;  %v2317_v36 = vpack.c.bf16 %v2315_v7, %v2315_v7  ;;  %v2896_v7 = vld [vmem:[#allocation7 + $0x1] ss:$0 sm:$0xff] }
0x1a23   :  { %3242 = vmatprep.mubr.msk.bf16.mxu0 %vm3578_vm0, %v3577_v0  ;;  %3239 = vmatpush3.bf16.msra.mxu0 %v3332_v37 }
0x1a24   :  { %3235 = vmatmul.mubr.msk.bf16.vlgmr.msra.gmra.mrb[72].mxu1 %vm213_vm2, %v2317_v36  ;;  %3240 = vmatprep.subr.bf16.mxu0 %v3577_v0 }
0x1a25   :  { %3250 = vmatprep.mubr.msk.bf16.mxu1 %vm3578_vm0, %v3577_v0 }
0x1a27   :  { %3241 = vmatpush3.bf16.msra.mxu0 %v3333_v38  ;;  %v2897_v38 = vld [vmem:[#allocation8 + $0x1] ss:$0 sm:$0xff] }
0x1a28   :  { %3254 = vmatprep.subr.bf16.mxu0 %v3577_v0 }
0x1af5   :  { %v2360_v39 = vpop.f32.mrb[68].mxu0 }
0x1af6   :  { %v3230_v40 = vpop.f32.mrb[69].mxu0 }
0x1af7   :  { %v2363_v41 = vpop.f32.mrb[70].mxu0  ;;  %v2408_v42 = vpop.f32.mrb[72].mxu1 }
0x1af8   :  { %v3315_v43 = vpack.i.bf16 %v2408_v42, %v2360_v39  ;;  %v3231_v44 = vpop.f32.mrb[71].mxu0  ;;  %v3236_v45 = vpop.f32.mrb[73].mxu1 }
0x1af9   :  { %v2411_v46 = vpop.f32.mrb[74].mxu1  ;;  %v3339_v44 = vld [vmem:[%s4264_s9 + $0x38] sm:$0xff]   ;;  %v2898_v45 = vld [vmem:[#allocation10 + $0x1] ss:$0 sm:$0xff] }
0x1afa   :  { %3316 = vrot.lane.b32.xlu1 %v3315_v43, %s3590_s8  ;;  %v3237_v47 = vpop.f32.mrb[75].mxu1  ;;  %v3338_v43 = vld [vmem:[%s4264_s9 + $0x30] sm:$0xff]  }
0x1b6c   :  { %v3317_v57 = vpop.permute.xlu1 %3316 }
0x1b6d   :  { %v3319_v58 = vunpack.i.h.bf16 %v3317_v57  ;;  %v3318_v60 = vunpack.i.l.bf16 %v3317_v57 }
0x1b6f   :  { %v2443_v2 = vsel %vm1127_vm5, %v2441_v62, %v3319_v58  ;;  %v2442_v5 = vsel %vm1127_vm5, %v2440_v61, %v3318_v60 }
0x1b70   :  { %v2444_v8 = vpack.c.bf16 %v2443_v2, %v2442_v5 }
0x1b72   :  { %3243 = vmatmul.mubr.msk.bf16.vlgmr.msra.gmra.mrb[72].mxu0 %vm163_vm1, %v2444_v8 }
0x1b73   :  { %3262 = vmatprep.mubr.msk.bf16.mxu0 %vm3578_vm0, %v3577_v0  ;;  %3255 = vmatpush3.bf16.msra.mxu0 %v3336_v29 }
0x1b74   :  { %3256 = vmatprep.subr.bf16.mxu0 %v3577_v0 }
0x1b77   :  { %3257 = vmatpush3.bf16.msra.mxu0 %v3337_v30 }
0x1b78   :  { %3258 = vmatprep.subr.bf16.mxu0 %v3577_v0 }
0x1b7b   :  { %3259 = vmatpush3.bf16.msra.mxu0 %v3338_v43 }
0x1b7c   :  { %3260 = vmatprep.subr.bf16.mxu0 %v3577_v0 }
0x1b7f   :  { %3261 = vmatpush3.bf16.msra.mxu0 %v3339_v44 }
0x1c45   :  { %v2500_v52 = vpop.f32.mrb[72].mxu0 }
0x1c46   :  { %v2501_v9 = vadd.f32 %v2892_v4, %v2500_v52  ;;  %v3244_v10 = vpop.f32.mrb[73].mxu0 }
0x1c47   :  { %v2503_v12 = vpop.f32.mrb[74].mxu0 }
0x1c48   :  { %v2504_v13 = vadd.f32 %v2892_v4, %v2503_v12  ;;  %v3245_v3 = vpop.f32.mrb[75].mxu0  ;;  %v2507_v11 = vadd.f32 %v2501_v9, %v3999_v17 }
0x1c4a   :  { %v2508_v48 = vadd.f32 %v2504_v13, %v4001_v18  ;;  %v2509_v53 = vsel %vm163_vm1, %v2507_v11, 0.0  ;;  %v3334_v18 = vld [vmem:[%s4262_s7 + $0x10] sm:$0xff]  }
0x1c4b   :  { %2510 = vadd.xlane.f32.xlu0 %v2509_v53  ;;  %3247 = vmatpush3.bf16.msra.mxu1 %v3334_v18  ;;  %v2909_v18 = vld [vmem:[%s4267_s12 + $0x1] ss:$0 sm:$0xff] }
0x1c4c   :  { %v2512_v15 = vsel %vm163_vm1, %v2508_v48, 0.0  ;;  %3248 = vmatprep.subr.bf16.mxu1 %v3577_v0  ;;  %v2902_v0 = vld [vmem:[%s4265_s10 + $0x1] ss:$0 sm:$0xff] }
0x1c4d   :  { %2513 = vadd.xlane.f32.xlu1 %v2512_v15 }
0x1c4f   :  { %3249 = vmatpush3.bf16.msra.mxu1 %v3335_v28 }
0x1cd8   :  { %v2511_v16 = vpop.xlane.xlu0 %2510 }
0x1cd9   :  { %v2515_v19 = vmul.f32 0.03125, %v2511_v16 }
0x1cda   :  { %v2514_v20 = vpop.xlane.xlu1 %2513 }
0x1cdb   :  { %v2517_v21 = vsub.f32 %v2507_v11, %v2515_v19  ;;  %v2516_v22 = vmul.f32 0.03125, %v2514_v20 }
0x1cdd   :  { %v2518_v23 = vsub.f32 %v2508_v48, %v2516_v22  ;;  %v2519_v14 = vmul.f32 %v2517_v21, %v2517_v21 }
0x1cdf   :  { %v2521_v25 = vsel %vm163_vm1, %v2519_v14, 0.0  ;;  %v2520_v26 = vmul.f32 %v2518_v23, %v2518_v23 }
0x1ce0   :  { %2522 = vadd.xlane.f32.xlu0 %v2521_v25  ;;  %v2908_v25 = vld [vmem:[%s4266_s11 + $0x1] ss:$0 sm:$0xff]  ;;  %s3591_s11 = smov [#allocation11]  }
0x1ce1   :  { %v2524_v17 = vsel %vm163_vm1, %v2520_v26, 0.0  ;;  %s2799_s12 = sshll.u32 %s3591_s11, 4  ;;  %s2800_s12 = int_to_ptr.vmem [resolvable:$true] %s2799_s12 }
0x1ce2   :  { %s3538_s27 = scalar_lea.vmem %s2800_s12, 32  ;;  %p3543_p13 = scmp.lt.s32.totalorder %s2800_s12, %s2800_s12 }
0x1ce3   :  { %p3539_p12 = scmp.ne.s32.totalorder %s2800_s12, %s3538_s27  ;;  %p3544_p0 = scmp.lt.s32.totalorder %s3538_s27, %s3538_s27 }
0x1ce4   :  { %2525 = vadd.xlane.f32.xlu0 %v2524_v17 }
0x1ce5   :  { %p3545_p1 = por %p3544_p0, %p3543_p13 }
0x1ce7   :  { %p3546_p2 = pnand %p3545_p1, %p3539_p12 }
0x1d6d   :  { %v2523_v31 = vpop.xlane.xlu0 %2522 }
0x1d6e   :  { %v2527_v32 = vmul.f32 0.03125, %v2523_v31 }
0x1d70   :  { %v2529_v33 = vadd.f32 1e-05, %v2527_v32 }
0x1d71   :  { %v2526_v34 = vpop.xlane.xlu0 %2525 }
0x1d72   :  { %3412 = vrsqrt.f32 %v2529_v33  ;;  %v2528_v27 = vmul.f32 0.03125, %v2526_v34 }
0x1d74   :  { %v2530_v24 = vadd.f32 1e-05, %v2528_v27 }
0x1d76   :  { %3414 = vrsqrt.f32 %v2530_v24 }
0x1d7c   :  { %v3413_v1 = vpop.eup %3412 }
0x1d7d   :  { %v2533_v6 = vmul.f32 %v3413_v1, %v2517_v21 }
0x1d7f   :  { %v2541_v36 = vmul.f32 %v2896_v7, %v2533_v6 }
0x1d80   :  { %v3415_v35 = vpop.eup %3414 }
0x1d81   :  { %v2534_v37 = vmul.f32 %v3415_v35, %v2518_v23  ;;  %v2549_v40 = vadd.f32 %v2897_v38, %v2541_v36 }
0x1d83   :  { %v2542_v39 = vmul.f32 %v2896_v7, %v2534_v37 }
0x1d85   :  { %v2550_v41 = vadd.f32 %v2897_v38, %v2542_v39 }
0x1d87   :  { %v2551_v42 = vpack.c.bf16 %v2550_v41, %v2549_v40 }
0x1d89   :  { %3251 = vmatmul.mubr.msk.bf16.vlgmr.msra.gmra.mrb[76].mxu1 %vm163_vm1, %v2551_v42 }
0x1e5c   :  { %v2607_v46 = vpop.f32.mrb[76].mxu1 }
0x1e5d   :  { %v2608_v47 = vadd.f32 %v2898_v45, %v2607_v46  ;;  %v3252_v49 = vpop.f32.mrb[77].mxu1 }
0x1e5e   :  { %v2610_v50 = vpop.f32.mrb[78].mxu1 }
0x1e5f   :  { %v2611_v51 = vadd.f32 %v2898_v45, %v2610_v50  ;;  %v3253_v63 = vpop.f32.mrb[79].mxu1  ;;  %v2614_v54 = vmax.f32 %v2608_v47, 0.0 }
0x1e61   :  { %v2615_v55 = vmax.f32 %v2611_v51, 0.0 }
0x1e63   :  { %v2616_v59 = vpack.c.bf16 %v2615_v55, %v2614_v54 }
0x1e65   :  { %3263 = vmatmul.mubr.msk.bf16.vlgmr.msra.gmra.mrb[76].mxu0 %vm1334_vm6, %v2616_v59 }
0x1f38   :  { %v2684_v56 = vpop.f32.mrb[76].mxu0 }
0x1f39   :  { %v2685_v57 = vadd.f32 %v2902_v0, %v2684_v56  ;;  %v3264_v58 = vpop.f32.mrb[77].mxu0 }
0x1f3a   :  { %v2687_v60 = vpop.f32.mrb[78].mxu0 }
0x1f3b   :  { %v2691_v61 = vadd.f32 %v2685_v57, %v2549_v40  ;;  %v2688_v62 = vadd.f32 %v2902_v0, %v2687_v60  ;;  %v3265_v2 = vpop.f32.mrb[79].mxu0 }
0x1f3d   :  { %v2693_v5 = vsel %vm163_vm1, %v2691_v61, 0.0  ;;  %v2692_v8 = vadd.f32 %v2688_v62, %v2550_v41 }
0x1f3e   :  { %2694 = vadd.xlane.f32.xlu1 %v2693_v5 }
0x1f3f   :  { %v2696_v4 = vsel %vm163_vm1, %v2692_v8, 0.0 }
0x1f40   :  { %2697 = vadd.xlane.f32.xlu0 %v2696_v4 }
0x1fcb   :  { %v2695_v52 = vpop.xlane.xlu1 %2694 }
0x1fcc   :  { %v2699_v9 = vmul.f32 0.03125, %v2695_v52 }
0x1fcd   :  { %v2698_v10 = vpop.xlane.xlu0 %2697 }
0x1fce   :  { %v2701_v12 = vsub.f32 %v2691_v61, %v2699_v9  ;;  %v2700_v13 = vmul.f32 0.03125, %v2698_v10 }
0x1fd0   :  { %v2702_v3 = vsub.f32 %v2692_v8, %v2700_v13  ;;  %v2703_v11 = vmul.f32 %v2701_v12, %v2701_v12 }
0x1fd2   :  { %v2705_v48 = vsel %vm163_vm1, %v2703_v11, 0.0  ;;  %v2704_v53 = vmul.f32 %v2702_v3, %v2702_v3 }
0x1fd3   :  { %2706 = vadd.xlane.f32.xlu1 %v2705_v48 }
0x1fd4   :  { %v2708_v15 = vsel %vm163_vm1, %v2704_v53, 0.0 }
0x1fd5   :  { %2709 = vadd.xlane.f32.xlu0 %v2708_v15 }
0x2060   :  { %v2707_v16 = vpop.xlane.xlu1 %2706 }
0x2061   :  { %v2711_v19 = vmul.f32 0.03125, %v2707_v16 }
0x2062   :  { %v2710_v20 = vpop.xlane.xlu0 %2709 }
0x2063   :  { %v2713_v21 = vadd.f32 1e-05, %v2711_v19  ;;  %v2712_v22 = vmul.f32 0.03125, %v2710_v20 }
0x2065   :  { %3416 = vrsqrt.f32 %v2713_v21  ;;  %v2714_v23 = vadd.f32 1e-05, %v2712_v22 }
0x2067   :  { %3418 = vrsqrt.f32 %v2714_v23 }
0x206f   :  { %v3417_v14 = vpop.eup %3416 }
0x2070   :  { %v2717_v26 = vmul.f32 %v3417_v14, %v2701_v12 }
0x2071   :  { %v3419_v17 = vpop.eup %3418 }
0x2072   :  { %v2725_v28 = vmul.f32 %v2908_v25, %v2717_v26  ;;  %v2718_v29 = vmul.f32 %v3419_v17, %v2702_v3 }
0x2074   :  { %v2726_v30 = vmul.f32 %v2908_v25, %v2718_v29  ;;  %v2733_v31 = vadd.f32 %v2909_v18, %v2725_v28 }
0x2076   :  { %v2734_v32 = vadd.f32 %v2909_v18, %v2726_v30  ;;  %v2735_v33 = vsel %vm163_vm1, %v2733_v31, 0.0 }
0x2077   :  { %v2736_v34 = vrot.slane %v2735_v33, 4 }
0x2078   :  { %v2742_v27 = vsel %vm163_vm1, %v2734_v32, 0.0 }
0x2079   :  { %v2737_v24 = vadd.f32 %v2736_v34, %v2735_v33  ;;  %v2743_v1 = vrot.slane %v2742_v27, 4 }
0x207b   :  { %v2738_v6 = vrot.slane %v2737_v24, 2  ;;  %v2744_v7 = vadd.f32 %v2743_v1, %v2742_v27 }
0x207d   :  { %v2739_v35 = vadd.f32 %v2738_v6, %v2737_v24  ;;  %v2745_v36 = vrot.slane %v2744_v7, 2 }
0x207f   :  { %v2740_v37 = vrot.slane %v2739_v35, 1  ;;  %v2746_v38 = vadd.f32 %v2745_v36, %v2744_v7 }
0x2081   :  { %v2741_v39 = vadd.f32 %v2740_v37, %v2739_v35  ;;  %v2747_v40 = vrot.slane %v2746_v38, 1 }
0x2083   :  { %v2748_v41 = vadd.f32 %v2747_v40, %v2746_v38  ;;  %v2750_v42 = vmul.f32 0.125, %v2741_v39 }
0x2085   :  { %v2751_v43 = vmul.f32 0.125, %v2748_v41 }
0x2087   :  { %v2755_v44 = vsel %vm2754_vm7, %v2751_v43, %v2750_v42 }
0x2088   :  { %v2758_v45 = vsel %vm2757_vm8, %v2755_v44, -inf }
0x2089   :  { %2759 = vmax.xlane.f32.xlu1 %v2758_v45 }
0x2116   :  { %v2760_v46 = vpop.xlane.xlu1 %2759 }
0x2117   :  { %v2762_v47 = vrot.slane %v2760_v46, 1  ;;  %v2765_v49 = vsub.f32 %v2750_v42, %v2760_v46 }
0x2119   :  { %v2766_v50 = vsub.f32 %v2751_v43, %v2762_v47  ;;  %v2767_v51 = vmul.f32 1.442695, %v2765_v49 }
0x211b   :  { %v2769_v63 = vmul.f32 1.442695, %v2766_v50 }
0x211d   :  { %3420 = vpow2.f32 %v2769_v63 }
0x211e   :  { %3422 = vpow2.f32 %v2767_v51 }
0x2127   :  { %v3421_v54 = vpop.eup %3420 }
0x2128   :  { %v2773_v55 = vrot.slane %v3421_v54, 7  ;;  %v3423_v59 = vpop.eup %3422 }
0x212a   :  { %v2774_v0 = vsel %vm2754_vm7, %v2773_v55, %v3423_v59 }
0x212b   :  { %v2776_v56 = vsel %vm2757_vm8, %v2774_v0, 0.0 }
0x212c   :  { %2777 = vadd.xlane.f32.xlu0 %v2776_v56 }
0x21b9   :  { %v2778_v57 = vpop.xlane.xlu0 %2777 }
0x21ba   :  { %v2780_v58 = vrot.slane %v2778_v57, 1  ;;  %3424 = vrcp.f32 %v2778_v57 }
0x21bc   :  { %3426 = vrcp.f32 %v2780_v58 }
0x21c4   :  { %v3425_v60 = vpop.eup %3424 }
0x21c5   :  { %v2784_v2 = vmul.f32 %v3425_v60, %v3423_v59 }
0x21c6   :  { %v3427_v61 = vpop.eup %3426 }
0x21c7   :  { %v2786_v62 = vmul.f32 %v3427_v61, %v3421_v54 }
0x21c9   :  { %v2789_v5 = vrot.slane %v2786_v62, 7 }
0x21cb   :  { %v2790_v8 = vsel %vm2754_vm7, %v2789_v5, %v2784_v2 }
0x21cc   :  { %2792 = vst.msk [vmem:[#allocation11] sm:$0x3] %vm2757_vm8, %v2790_v8 }
0x21cd   :  { %3549 = shalt.err (!%p3546_p2)
}
0x21ce   :  { %s3550_s22 = scalar_lea.hbm %s4268_s13, 32 }
0x21cf   :  { %p3551_p3 = scmp.ne.s32.totalorder %s4268_s13, %s3550_s22  ;;  %p3554_p4 = scmp.lt.u32.totalorder %s3550_s22, %s4268_s13 }
0x21d1   :  { %p3556_p5 = pnand %p3554_p4, %p3551_p3 }
0x21d3   :  { %3559 = shalt.err (!%p3556_p5)
}
0x21d4   :  { %2802 = dma.vmem_to_hbm [thread:$0]  %s2800_s12, 32, %s4268_s13, [#allocation4]  }
0x21d5   :  { %3566 = dma.done.wait [#allocation4], 32  }
0x21d6   :  { %3567 = vsyncadd [#allocation4], 4294967264 }
0x21d7   :  { %2806 = vsyncpa [#allocation3], 1 }
0x21d8   :  { %2807 = vsyncpa [#allocation6], 1 }
0x21d9   :  { %2808 = vsyncpa [#allocation9], 1 }
0x21da   :  { %2809 = vsyncpa [#allocation4], 1 }

</bundles_post_ra>
